<compile_context>
chip_gen: v7x
topology: tpu7x:2x2x1
jax: 0.10.0
libtpu: 0.0.40
codegen_flags: <defaults>
</compile_context>

<pallas_src>
import functools

import jax
import jax.numpy as jnp
from jax import lax
from jax.experimental import pallas as pl
from jax.experimental.pallas import tpu as pltpu


def _sagan_attn_kernel(x_ref, wqh_ref, wk_ref, wv_ref, scale_ref,
                       o_ref, k_scr, acc_scr, *,
                       hd, tj, reassoc, bf16_softmax):
    # x_ref     : (1, C, N)   full spatial extent of this batch element (f32)
    # wqh_ref   : (2*Hd, C)   stacked [wq; wh] 1x1 conv weights (bf16)
    # wk_ref    : (Hd, C)     keys 1x1 conv weight (bf16)
    # wv_ref    : (C, Hd)     values 1x1 conv weight (bf16)
    # scale_ref : (1,) SMEM   learned residual scale
    # k_scr     : (Hd, N) bf16   keys for the whole batch element (persistent)
    # acc_scr   : (Cacc, N) f32  output accumulator over query tiles
    jt = pl.program_id(1)
    nj = pl.num_programs(1)

    # --- once per batch element: key projection over the full spatial axis ----
    @pl.when(jt == 0)
    def _():
        x_bf = x_ref[0].astype(jnp.bfloat16)                        # (C, N)
        k_scr[...] = jnp.dot(wk_ref[...], x_bf,
                             preferred_element_type=jnp.float32
                             ).astype(jnp.bfloat16)
        acc_scr[...] = jnp.zeros_like(acc_scr)

    # --- per query tile: slice x out of the resident block; fused Q/H proj ----
    start = pl.multiple_of(jt * tj, tj)
    xt_bf = x_ref[0, :, pl.ds(start, tj)].astype(jnp.bfloat16)      # (C, TJ)
    qh = jnp.dot(wqh_ref[...], xt_bf,
                 preferred_element_type=jnp.float32)                # (2Hd, TJ)
    q_t = qh[0:hd, :].astype(jnp.bfloat16)                          # (Hd, TJ)
    h_t = qh[hd:, :].astype(jnp.bfloat16)                           # (Hd, TJ)

    # scores, transposed: s_t[j, i] = sum_c q[c, j] * k[c, i]  -> (TJ, N)
    s_t = lax.dot_general(q_t, k_scr[...], (((0,), (0,)), ((), ())),
                          preferred_element_type=jnp.float32)
    # softmax over i (torch dim=1) == last (lane) axis here
    m = jnp.max(s_t, axis=-1, keepdims=True)                        # f32
    if bf16_softmax:
        # bf16 VPU/EUP path (v6e/v7x): slims the (TJ, N) elementwise chain.
        e = jnp.exp((s_t - m).astype(jnp.bfloat16))                 # (TJ, N) bf16
        denom = jnp.sum(e.astype(jnp.float32), axis=-1, keepdims=True)
        inv = pl.reciprocal(denom, approx=True).astype(jnp.bfloat16)
        beta_bf = e * inv                                           # (TJ, N) bf16
    else:
        e = jnp.exp(s_t - m)                                        # f32
        inv = pl.reciprocal(jnp.sum(e, axis=-1, keepdims=True), approx=True)
        beta_bf = (e * inv).astype(jnp.bfloat16)                    # (TJ, N)

    if reassoc:
        # apply the values 1x1 conv before the N^2 contraction (C < Hd)
        v_t = jnp.dot(wv_ref[...], h_t,
                      preferred_element_type=jnp.float32).astype(jnp.bfloat16)
    else:
        v_t = h_t                                                   # (Hd, TJ)

    # acc[c, i] += sum_{j in tile} v[c, j] * beta[j, i]
    acc_scr[...] += jnp.dot(v_t, beta_bf, preferred_element_type=jnp.float32)

    # --- finalize: scale * attention + residual --------------------------------
    @pl.when(jt == nj - 1)
    def _():
        if reassoc:
            attn = acc_scr[...]                                     # (C, N) f32
        else:
            # tiny (C, Hd) x (Hd, N) matmul kept in f32: avoids rounding the
            # large accumulated values down to bf16 before the last projection.
            attn = jnp.dot(wv_ref[...].astype(jnp.float32), acc_scr[...],
                           preferred_element_type=jnp.float32)      # (C, N)
        x_f32 = x_ref[0].astype(jnp.float32)
        o_ref[0] = (scale_ref[0] * attn + x_f32).astype(o_ref.dtype)


def _vmem_capacity_bytes():
    try:
        return int(pltpu.get_tpu_info().vmem_capacity_bytes)
    except Exception:
        pass
    try:
        if "v7" in jax.devices()[0].device_kind.lower():
            return 64 * 2**20
    except Exception:
        pass
    return 128 * 2**20


def _device_kind():
    try:
        return jax.devices()[0].device_kind.lower()
    except Exception:
        return ""


def _pick_q_tile(n, q_tile_cap, budget, est_fn):
    """Largest divisor of n (<= cap) whose VMEM estimate fits the budget.
    Prefers lane-aligned (x128), then sublane-aligned (x8) tiles."""
    divs = [d for d in range(1, n + 1) if n % d == 0 and d <= q_tile_cap]
    divs.sort(key=lambda d: (d % 128 == 0, d % 8 == 0, d), reverse=True)
    for d in divs:
        if est_fn(d) <= budget:
            return d
    # TODO(synk): pad N to a multiple of 128 (with -inf masking) if n has no
    # usable divisor; degenerate inputs fall back to the smallest divisor.
    return min(divs)


def self_attention(x_nchw, wk, wq, wh, wv, scale, *, q_tile=None):
    B, C, Hs, Ws = x_nchw.shape
    N = Hs * Ws
    Hd = wk.shape[0]
    xf = x_nchw.reshape(B, C, N)

    reassoc = C < Hd                      # apply wv before the N^2 contraction
    c_acc = C if reassoc else Hd

    vmem_cap = _vmem_capacity_bytes()
    budget = int(0.75 * vmem_cap)         # leave compiler / internal-scratch headroom
    if q_tile is None:
        # 256-row query tiles fit comfortably on 128 MiB parts (v5e/v6e);
        # stay at 128 on v7x (64 MiB per TensorCore).
        q_tile = 256 if vmem_cap >= (100 << 20) else 128

    kind = _device_kind()
    bf16_softmax = ("v6" in kind) or ("v7" in kind)   # bf16 VPU/EUP available

    def est_bytes(tj):
        sm_bytes = (2 + 2) if bf16_softmax else (4 + 2)     # e + beta per elem
        return (2 * C * N * 4                 # x block (double-buffered input)
                + 2 * C * N * 4               # output block (double-buffered)
                + Hd * N * 2                  # key scratch (bf16)
                + c_acc * N * 4               # f32 output accumulator
                + tj * N * (4 + sm_bytes)     # s_t (f32) + softmax temporaries
                + tj * N * 2                  # slack for fused temporaries
                + (3 * Hd * C + C * Hd) * 2 * 2   # weights (double-buffered)
                + (2 << 20))                  # fixed margin

    tj = _pick_q_tile(N, q_tile, budget, est_bytes)
    nj = N // tj
    est = est_bytes(tj)
    vmem_limit = int(min(vmem_cap - (8 << 20), max(32 << 20, int(1.25 * est))))

    wqh = jnp.concatenate([wq, wh], axis=0).astype(jnp.bfloat16)    # (2Hd, C)
    wk_bf = wk.astype(jnp.bfloat16)
    wv_bf = wv.astype(jnp.bfloat16)

    kernel = functools.partial(_sagan_attn_kernel, hd=Hd, tj=tj,
                               reassoc=reassoc, bf16_softmax=bf16_softmax)

    # TODO(synk): when B == 1 on v7x (2 TensorCores), split the j axis into a
    # leading parallel grid dim with per-core partial accumulators + a combine.
    out = pl.pallas_call(
        kernel,
        out_shape=jax.ShapeDtypeStruct((B, C, N), x_nchw.dtype),
        grid_spec=pltpu.PrefetchScalarGridSpec(
            num_scalar_prefetch=0,
            grid=(B, nj),
            in_specs=[
                pl.BlockSpec((1, C, N), lambda b, j: (b, 0, 0)),    # x, full N
                pl.BlockSpec((2 * Hd, C), lambda b, j: (0, 0)),     # [wq; wh]
                pl.BlockSpec((Hd, C), lambda b, j: (0, 0)),         # wk
                pl.BlockSpec((C, Hd), lambda b, j: (0, 0)),         # wv
                pl.BlockSpec(memory_space=pltpu.SMEM),              # scale
            ],
            out_specs=pl.BlockSpec((1, C, N), lambda b, j: (b, 0, 0)),
            scratch_shapes=[
                pltpu.VMEM((Hd, N), jnp.bfloat16),                  # keys
                pltpu.VMEM((c_acc, N), jnp.float32),                # accumulator
            ],
        ),
        input_output_aliases={0: 0},       # x donated to the output buffer
        compiler_params=pltpu.CompilerParams(
            dimension_semantics=("parallel", "arbitrary"),
            vmem_limit_bytes=vmem_limit,
        ),
    )(xf, wqh, wk_bf, wv_bf, scale)
    return out.reshape(B, C, Hs, Ws)


def self_attention_reference(x_nchw, wk, wq, wh, wv, scale):
    """Pure-JAX (f32) reference mirroring the PyTorch forward."""
    B, C, Hs, Ws = x_nchw.shape
    N = Hs * Ws
    xf = x_nchw.reshape(B, C, N)
    k = jnp.einsum('hc,bcn->bhn', wk, xf)
    q = jnp.einsum('hc,bcn->bhn', wq, xf)
    h = jnp.einsum('hc,bcn->bhn', wh, xf)
    s = jnp.einsum('bci,bcj->bij', k, q)
    beta = jax.nn.softmax(s, axis=1)               # softmax over i (torch dim=1)
    att = jnp.einsum('bij,bcj->bci', beta, h)
    out = jnp.einsum('ch,bhn->bcn', wv, att)
    return (scale[0] * out + xf).reshape(B, C, Hs, Ws)


if __name__ == "__main__":
    B, C, Hd, Hs, Ws = 2, 4, 16, 16, 16   # input_channels=4, hidden_channels=16

    key = jax.random.PRNGKey(0)
    kx, kk, kq, kh, kv = jax.random.split(key, 5)

    x = jax.random.normal(kx, (B, C, Hs, Ws), dtype=jnp.float32)
    # 1x1 conv weights (squeeze the trailing 1x1 kernel dims of Conv2d weights)
    wk = jax.random.normal(kk, (Hd, C), dtype=jnp.float32) * 0.1
    wq = jax.random.normal(kq, (Hd, C), dtype=jnp.float32) * 0.1
    wh = jax.random.normal(kh, (Hd, C), dtype=jnp.float32) * 0.1
    wv = jax.random.normal(kv, (C, Hd), dtype=jnp.float32) * 0.1
    # Module default scale_init=0.0 would make output==input; use a nonzero
    # scale to exercise the attention path deterministically.
    scale = jnp.array([0.5], dtype=jnp.float32)

    ref = self_attention_reference(x, wk, wq, wh, wv, scale)

    out = self_attention(x, wk, wq, wh, wv, scale)
    jax.block_until_ready(out)

    assert out.shape == x.shape
    # bf16 MXU inputs with f32 accumulation -> tolerance loosened vs pure-f32 ref.
    assert jnp.allclose(out, ref, atol=2e-2, rtol=2e-2), (
        float(jnp.max(jnp.abs(out - ref))))

    print("KERNEL_OK")
</pallas_src>

<mosaic_0001>
module attributes {stable_mosaic.version = 11 : i64} {
  func.func @_sagan_attn_kernel(%arg0: i32, %arg1: i32, %arg2: memref<1x4x256xf32, #tpu.memory_space<vmem>>, %arg3: memref<32x4xbf16, #tpu.memory_space<vmem>>, %arg4: memref<16x4xbf16, #tpu.memory_space<vmem>>, %arg5: memref<4x16xbf16, #tpu.memory_space<vmem>>, %arg6: memref<1xf32, #tpu.memory_space<smem>>, %arg7: memref<1x4x256xf32, #tpu.memory_space<vmem>>, %arg8: memref<16x256xbf16, #tpu.memory_space<vmem>>, %arg9: memref<4x256xf32, #tpu.memory_space<vmem>>) attributes {dimension_semantics = [#tpu.dimension_semantics<parallel>, #tpu.dimension_semantics<arbitrary>], iteration_bounds = array<i64: 2, 1>, scalar_prefetch = 0 : i64, scratch_operands = 2 : i64, tpu.core_type = #tpu.core_type<tc>, window_params = [{transform_indices = @transform_0, window_bounds = array<i64: 1, 4, 256>}, {pipeline_mode = #tpu.pipeline_mode<synchronous>, transform_indices = @transform_1, window_bounds = array<i64: 32, 4>}, {pipeline_mode = #tpu.pipeline_mode<synchronous>, transform_indices = @transform_2, window_bounds = array<i64: 16, 4>}, {pipeline_mode = #tpu.pipeline_mode<synchronous>, transform_indices = @transform_3, window_bounds = array<i64: 4, 16>}, {transform_indices = @transform_4, window_bounds = array<i64: 1>}, {transform_indices = @transform_5, window_bounds = array<i64: 1, 4, 256>}]} {
    %c0_i32 = arith.constant 0 : i32
    %0 = arith.cmpi eq, %arg1, %c0_i32 : i32
    %1 = arith.extui %0 : i1 to i32
    %c0_i32_0 = arith.constant 0 : i32
    %2 = arith.cmpi ne, %1, %c0_i32_0 : i32
    scf.if %2 {
      %c0_19 = arith.constant 0 : index
      %c0_20 = arith.constant 0 : index
      %c0_21 = arith.constant 0 : index
      %38 = vector.load %arg2[%c0_19, %c0_20, %c0_21] : memref<1x4x256xf32, #tpu.memory_space<vmem>>, vector<1x4x256xf32>
      %39 = vector.shape_cast %38 : vector<1x4x256xf32> to vector<4x256xf32>
      %40 = arith.truncf %39 : vector<4x256xf32> to vector<4x256xbf16>
      %c0_22 = arith.constant 0 : index
      %c0_23 = arith.constant 0 : index
      %41 = vector.load %arg4[%c0_22, %c0_23] : memref<16x4xbf16, #tpu.memory_space<vmem>>, vector<16x4xbf16>
      %cst_24 = arith.constant dense<0.000000e+00> : vector<16x256xf32>
      %42 = tpu.matmul %41, %40, %cst_24 {dimension_numbers = #tpu.dot_dimension_numbers<[1], [0], [0], [1], [0, 0, 1, 1], [], []>} : vector<16x4xbf16>, vector<4x256xbf16>, vector<16x256xf32> -> vector<16x256xf32>
      %43 = arith.truncf %42 : vector<16x256xf32> to vector<16x256xbf16>
      %c0_25 = arith.constant 0 : index
      %c0_26 = arith.constant 0 : index
      %44 = vector.load %arg8[%c0_25, %c0_26] : memref<16x256xbf16, #tpu.memory_space<vmem>>, vector<16x256xbf16>
      tpu.vector_store %arg8[%c0_25, %c0_26], %43 {strides = array<i32>} : memref<16x256xbf16, #tpu.memory_space<vmem>>, vector<16x256xbf16>,
      %cst_27 = arith.constant 0.000000e+00 : f32
      %45 = vector.broadcast %cst_27 : f32 to vector<4x256xf32>
      %c0_28 = arith.constant 0 : index
      %c0_29 = arith.constant 0 : index
      %46 = vector.load %arg9[%c0_28, %c0_29] : memref<4x256xf32, #tpu.memory_space<vmem>>, vector<4x256xf32>
      tpu.vector_store %arg9[%c0_28, %c0_29], %45 {strides = array<i32>} : memref<4x256xf32, #tpu.memory_space<vmem>>, vector<4x256xf32>,
    } else {
    }
    %c256_i32 = arith.constant 256 : i32
    %3 = arith.muli %arg1, %c256_i32 : i32
    %4 = tpu.assume_multiple %3, 256 : i32
    %c0 = arith.constant 0 : index
    %c0_1 = arith.constant 0 : index
    %5 = arith.index_cast %4 : i32 to index
    %6 = vector.load %arg2[%c0, %c0_1, %5] : memref<1x4x256xf32, #tpu.memory_space<vmem>>, vector<1x4x256xf32>
    %7 = vector.shape_cast %6 : vector<1x4x256xf32> to vector<4x256xf32>
    %8 = arith.truncf %7 : vector<4x256xf32> to vector<4x256xbf16>
    %c0_2 = arith.constant 0 : index
    %c0_3 = arith.constant 0 : index
    %9 = vector.load %arg3[%c0_2, %c0_3] : memref<32x4xbf16, #tpu.memory_space<vmem>>, vector<32x4xbf16>
    %cst = arith.constant dense<0.000000e+00> : vector<32x256xf32>
    %10 = tpu.matmul %9, %8, %cst {dimension_numbers = #tpu.dot_dimension_numbers<[1], [0], [0], [1], [0, 0, 1, 1], [], []>} : vector<32x4xbf16>, vector<4x256xbf16>, vector<32x256xf32> -> vector<32x256xf32>
    %11 = vector.extract_strided_slice %10 {offsets = [0, 0], sizes = [16, 256], strides = [1, 1]} : vector<32x256xf32> to vector<16x256xf32>
    %12 = arith.truncf %11 : vector<16x256xf32> to vector<16x256xbf16>
    %13 = vector.extract_strided_slice %10 {offsets = [16, 0], sizes = [16, 256], strides = [1, 1]} : vector<32x256xf32> to vector<16x256xf32>
    %14 = arith.truncf %13 : vector<16x256xf32> to vector<16x256xbf16>
    %c0_4 = arith.constant 0 : index
    %c0_5 = arith.constant 0 : index
    %15 = vector.load %arg8[%c0_4, %c0_5] : memref<16x256xbf16, #tpu.memory_space<vmem>>, vector<16x256xbf16>
    %cst_6 = arith.constant dense<0.000000e+00> : vector<256x256xf32>
    %16 = tpu.matmul %12, %15, %cst_6 {dimension_numbers = #tpu.dot_dimension_numbers<[0], [0], [1], [1], [0, 1, 1, 1], [], []>} : vector<16x256xbf16>, vector<16x256xbf16>, vector<256x256xf32> -> vector<256x256xf32>
    %cst_7 = arith.constant dense<0xFF800000> : vector<256xf32>
    %17 = vector.multi_reduction <maximumf>, %16, %cst_7 [1] : vector<256x256xf32> to vector<256xf32>
    %18 = vector.shape_cast %17 : vector<256xf32> to vector<256x1xf32>
    %19 = vector.broadcast %18 : vector<256x1xf32> to vector<256x256xf32>
    %20 = arith.subf %16, %19 : vector<256x256xf32>
    %21 = math.exp %20 : vector<256x256xf32>
    %cst_8 = arith.constant dense<0.000000e+00> : vector<256xf32>
    %22 = vector.multi_reduction <add>, %21, %cst_8 [1] : vector<256x256xf32> to vector<256xf32>
    %23 = vector.shape_cast %22 : vector<256xf32> to vector<256x1xf32>
    %24 = tpu.reciprocal %23 {approx = true} : vector<256x1xf32> -> vector<256x1xf32>
    %25 = vector.broadcast %24 : vector<256x1xf32> to vector<256x256xf32>
    %26 = arith.mulf %21, %25 : vector<256x256xf32>
    %27 = arith.truncf %26 : vector<256x256xf32> to vector<256x256xbf16>
    %c0_9 = arith.constant 0 : index
    %c0_10 = arith.constant 0 : index
    %28 = vector.load %arg5[%c0_9, %c0_10] : memref<4x16xbf16, #tpu.memory_space<vmem>>, vector<4x16xbf16>
    %cst_11 = arith.constant dense<0.000000e+00> : vector<4x256xf32>
    %29 = tpu.matmul %28, %14, %cst_11 {dimension_numbers = #tpu.dot_dimension_numbers<[1], [0], [0], [1], [0, 0, 1, 1], [], []>} : vector<4x16xbf16>, vector<16x256xbf16>, vector<4x256xf32> -> vector<4x256xf32>
    %30 = arith.truncf %29 : vector<4x256xf32> to vector<4x256xbf16>
    %c0_12 = arith.constant 0 : index
    %c0_13 = arith.constant 0 : index
    %31 = vector.load %arg9[%c0_12, %c0_13] : memref<4x256xf32, #tpu.memory_space<vmem>>, vector<4x256xf32>
    %cst_14 = arith.constant dense<0.000000e+00> : vector<4x256xf32>
    %32 = tpu.matmul %30, %27, %cst_14 {dimension_numbers = #tpu.dot_dimension_numbers<[1], [0], [0], [1], [0, 0, 1, 1], [], []>} : vector<4x256xbf16>, vector<256x256xbf16>, vector<4x256xf32> -> vector<4x256xf32>
    %33 = arith.addf %31, %32 : vector<4x256xf32>
    %c0_15 = arith.constant 0 : index
    %c0_16 = arith.constant 0 : index
    %34 = vector.load %arg9[%c0_15, %c0_16] : memref<4x256xf32, #tpu.memory_space<vmem>>, vector<4x256xf32>
    tpu.vector_store %arg9[%c0_15, %c0_16], %33 {strides = array<i32>} : memref<4x256xf32, #tpu.memory_space<vmem>>, vector<4x256xf32>,
    %c0_i32_17 = arith.constant 0 : i32
    %35 = arith.cmpi eq, %arg1, %c0_i32_17 : i32
    %36 = arith.extui %35 : i1 to i32
    %c0_i32_18 = arith.constant 0 : i32
    %37 = arith.cmpi ne, %36, %c0_i32_18 : i32
    scf.if %37 {
      %c0_19 = arith.constant 0 : index
      %c0_20 = arith.constant 0 : index
      %38 = vector.load %arg9[%c0_19, %c0_20] : memref<4x256xf32, #tpu.memory_space<vmem>>, vector<4x256xf32>
      %c0_21 = arith.constant 0 : index
      %c0_22 = arith.constant 0 : index
      %c0_23 = arith.constant 0 : index
      %39 = vector.load %arg2[%c0_21, %c0_22, %c0_23] : memref<1x4x256xf32, #tpu.memory_space<vmem>>, vector<1x4x256xf32>
      %40 = vector.shape_cast %39 : vector<1x4x256xf32> to vector<4x256xf32>
      %c0_24 = arith.constant 0 : index
      %41 = memref.load %arg6[%c0_24] : memref<1xf32, #tpu.memory_space<smem>>
      %42 = vector.broadcast %41 : f32 to vector<4x256xf32>
      %43 = arith.mulf %42, %38 : vector<4x256xf32>
      %44 = arith.addf %43, %40 : vector<4x256xf32>
      %c0_25 = arith.constant 0 : index
      %c0_26 = arith.constant 0 : index
      %c0_27 = arith.constant 0 : index
      %45 = vector.load %arg7[%c0_25, %c0_26, %c0_27] : memref<1x4x256xf32, #tpu.memory_space<vmem>>, vector<1x4x256xf32>
      %46 = vector.shape_cast %45 : vector<1x4x256xf32> to vector<4x256xf32>
      %47 = vector.shape_cast %44 : vector<4x256xf32> to vector<1x4x256xf32>
      tpu.vector_store %arg7[%c0_25, %c0_26, %c0_27], %47 {strides = array<i32>} : memref<1x4x256xf32, #tpu.memory_space<vmem>>, vector<1x4x256xf32>,
    } else {
    }
    return
  }
  func.func @transform_0(%arg0: i32, %arg1: i32) -> (i32, i32, i32) {
    %c0_i32 = arith.constant 0 : i32
    %c0_i32_0 = arith.constant 0 : i32
    %c0_i32_1 = arith.constant 0 : i32
    return %arg0, %c0_i32, %c0_i32_0 : i32, i32, i32
  }
  func.func @transform_1(%arg0: i32, %arg1: i32) -> (i32, i32) {
    %c0_i32 = arith.constant 0 : i32
    %c0_i32_0 = arith.constant 0 : i32
    %c0_i32_1 = arith.constant 0 : i32
    return %c0_i32, %c0_i32_0 : i32, i32
  }
  func.func @transform_2(%arg0: i32, %arg1: i32) -> (i32, i32) {
    %c0_i32 = arith.constant 0 : i32
    %c0_i32_0 = arith.constant 0 : i32
    %c0_i32_1 = arith.constant 0 : i32
    return %c0_i32, %c0_i32_0 : i32, i32
  }
  func.func @transform_3(%arg0: i32, %arg1: i32) -> (i32, i32) {
    %c0_i32 = arith.constant 0 : i32
    %c0_i32_0 = arith.constant 0 : i32
    %c0_i32_1 = arith.constant 0 : i32
    return %c0_i32, %c0_i32_0 : i32, i32
  }
  func.func @transform_4(%arg0: i32, %arg1: i32) -> i32 {
    %c0_i32 = arith.constant 0 : i32
    %c0_i32_0 = arith.constant 0 : i32
    return %c0_i32 : i32
  }
  func.func @transform_5(%arg0: i32, %arg1: i32) -> (i32, i32, i32) {
    %c0_i32 = arith.constant 0 : i32
    %c0_i32_0 = arith.constant 0 : i32
    %c0_i32_1 = arith.constant 0 : i32
    return %arg0, %c0_i32, %c0_i32_0 : i32, i32, i32
  }
}

</mosaic_0001>

<bundles_post_ra>
// kernel: tpu_custom_call.1
= control target key start
LH: loop header
LB: loop body
LE: loop exit
PB: predicated region body
PF: predicated region fallthrough
CT: control target
= control target key end

     0   :  { %s2619_s0 = inlined_call_operand.hbm [shape: f32[2,4,256], index: 0, kind: input, shape index: {}, may-alias: {0,5}]   ;;  %s2620_s1 = inlined_call_operand.vmem [shape: bf16[32,4], index: 1, kind: input, shape index: {}]   ;;  %s2621_s2 = inlined_call_operand.vmem [shape: bf16[16,4], index: 2, kind: input, shape index: {}]   ;;  %s2622_s3 = inlined_call_operand.vmem [shape: bf16[4,16], index: 3, kind: input, shape index: {}]   ;;  %s2623_s4 = inlined_call_operand.<no memory space> [shape: f32[1], index: 4, kind: input, shape index: {}]   ;;  %s2624_s5 = inlined_call_operand.hbm [shape: f32[2,4,256], index: 5, kind: output, shape index: {}, may-alias: {0,5}]  }
   0x1   :  { %10 = sst [smem:[#allocation4]] %s2623_s4 }
   0x2   :  { %11 = vsyncpa [#allocation6], 0 }
   0x3   :  { %13 = vsyncpa [#allocation6 + $0x1], 0 }
   0x4   :  { %14 = vsyncpa [#allocation7], 0 }
   0x5   :  { %16 = vsyncpa [#allocation7 + $0x1], 0  ;;  %s1868_s20 = smov 0   ;;  %s1870_s21 = smov 0  }
   0x6   :  { %s1872_s22 = smov 0   ;;  %s1874_s23 = smov 0  }
   0x7   :  { %s1876_s24 = smov 0   ;;  %s1878_s25 = smov 0  }
   0x8 LB: > { %s1415_s4 = sadd.s32 4294967295, %s1830_s25   ;;  %s1416_s26 = sadd.s32 4294967294, %s1830_s25   ;;  %s1830_s25 = sphi %s1878_s25, %s22_s25   ;;  %s1826_s24 = sphi %s1876_s24, %s2727_s24   ;;  %s1822_s23 = sphi %s1874_s23, %s2726_s23   ;;  %s1818_s22 = sphi %s1872_s22, %s2725_s22   ;;  %s1814_s21 = sphi %s1870_s21, %s2724_s21   ;;  %s1810_s20 = sphi %s1868_s20, %s2723_s20  }
   0x9   : > { %s34_s27 = sadd.s32 1, %s1826_s24  ;;  %s41_s28 = sadd.s32 1, %s1818_s22 }
   0xa   : > { %p36_p0 = scmp.ge.s32.totalorder %s34_s27, 2  ;;  %p48_p1 = scmp.ne.s32.totalorder %s1818_s22, %s1814_s21 }
   0xb   : > { %p49_p2 = scmp.eq.s32.totalorder %s1830_s25, 0  ;;  %p54_p3 = scmp.ne.s32.totalorder %s1814_s21, %s1810_s20 }
   0xc   : > { %s2729_s27 = smov (%p36_p0, %s34_s27), 0  ;;  %p55_p5 = scmp.eq.s32.totalorder %s1415_s4, 0 }
   0xd   : > { %p1909_p4 = por %p49_p2, %p48_p1  ;;  %s38_s30 = ssub.s32 %s1826_s24, %s2729_s27 }
   0xe   : > { %p162_p6 = scmp.eq.s32.totalorder %s1415_s4, 1  ;;  %p39_p7 = scmp.eq.s32.totalorder %s38_s30, 0 }
   0xf   : > { %p1915_p8 = por %p55_p5, %p54_p3  ;;  %p168_p10 = scmp.eq.s32.totalorder %s1416_s26, 1 }
  0x10   : > { %p1919_p9 = por %p162_p6, %p48_p1  ;;  %p1471_p13 = scmp.lt.s32.totalorder %s1830_s25, 2 }
  0x11   : > { %s1924_s8 = scalar_select %p39_p7, %s1818_s22, %s41_s28  }
  0x12   : > { %s2656_s7 = scalar_select %p1919_p9, 1, 0 }
  0x13   : > { %p1926_p11 = por %p168_p10, %p54_p3  ;;  %s200_s10 = sand.u32 1, %s1818_s22  }
  0x14   : > { %s1419_s11 = sshll.u32 %s200_s10, 3  ;;  %s1455_s12 = sshll.u32 %s1826_s24, 7 }
  0x15   : > { %s2657_s9 = scalar_select %p1926_p11, 1, 0 }
  0x16   : > { %s1937_s15 = scalar_lea.hbm %s2619_s0, %s1455_s12  ;;  %s204_s16 = scalar_lea.vmem [#allocation5], %s1419_s11 }
  0x17   : > { %s212_s17 = sshll.u32 %s204_s16, 4  ;;  %p1943_p0 = pnand %p1471_p13, %p1909_p4  ;;  %s1939_s17 = int_to_ptr.vmem [resolvable:$true] %s212_s17 }
  0x18   : > { %s201_s19 = scalar_lea.sflag [#allocation6], %s200_s10  ;;  %s1718_s4 = scalar_lea.hbm %s1937_s15, 128 }
  0x19   : > { %p1719_p3 = scmp.ne.s32.totalorder %s1937_s15, %s1718_s4  ;;  %p1720_p5 = pneg %p1943_p0 }
  0x1a   : > { %s1723_s29 = scalar_lea.hbm %s2619_s0, 256  ;;  %p1724_p4 = scmp.lt.u32.totalorder %s1937_s15, %s2619_s0 }
  0x1b   : > { %p1721_p6 = pnand %p1720_p5, %p1719_p3  ;;  %p1725_p10 = scmp.lt.u32.totalorder %s1723_s29, %s1718_s4 }
  0x1c   : > { %p1727_p12 = scmp.lt.u32.totalorder %s1718_s4, %s1937_s15 }
  0x1d   : > { %p1722_p7 = pneg %p1721_p6  ;;  %p1726_p13 = por %p1725_p10, %p1724_p4 }
  0x1f   : > { %p1728_p1 = por %p1727_p12, %p1726_p13 }
  0x21   : > { %p1729_p2 = pnand %p1728_p1, %p1722_p7 }
  0x23   : > { %1732 = shalt.err (!%p1729_p2)
}
  0x24   : > { %s1733_s10 = scalar_lea.vmem %s1939_s17, 128  ;;  %s1832_s12 = smov [#allocation5]  }
  0x25   : > { %p1734_p3 = scmp.ne.s32.totalorder %s1939_s17, %s1733_s10  ;;  %s1738_s13 = sshll.u32 %s1832_s12, 4  ;;  %s1739_s13 = int_to_ptr.vmem [resolvable:$false] %s1738_s13 }
  0x26   : > { %s1740_s14 = scalar_lea.vmem %s1739_s13, 256  ;;  %p1741_p9 = scmp.lt.s32.totalorder %s1939_s17, %s1739_s13 }
  0x27   : > { %p1736_p6 = pnand %p1734_p3, %p1720_p5  ;;  %p1742_p4 = scmp.lt.s32.totalorder %s1740_s14, %s1733_s10 }
  0x29   : > { %p1737_p11 = pneg %p1736_p6  ;;  %p1743_p10 = por %p1742_p4, %p1741_p9 }
  0x2b   : > { %p1744_p12 = pnand %p1743_p10, %p1737_p11 }
  0x2d   : > { %1747 = shalt.err (!%p1744_p12)
}
  0x2e   : > { %1466 = dma.hbm_to_vmem [thread:$0]  (!%p1943_p0), %s1937_s15, 128, %s1939_s17, %s201_s19  }
  0x2f   : > { %p2659_p1 = scmp.lt.s32.totalorder %s1830_s25, 3  ;;  %p2660_p2 = scmp.ge.s32.totalorder %s1830_s25, 1 }
  0x31   : > { %p218_p5 = pnand %p2660_p2, %p2659_p1 }
  0x33   : > { %221 = sbr.rel (%p218_p5) target bundleno = 1269 (0x4f5), region = 40 }
  0x3a   : > { %s1979_s16 = sand.u32 1, %s1814_s21  }
  0x3b   : > { %s1423_s4 = sshll.u32 %s1979_s16, 3  ;;  %s224_s26 = scalar_lea.sflag [#allocation6], %s1979_s16 }
  0x3c   : > { %s1985_s18 = scalar_lea.vmem [#allocation5], %s1423_s4 }
  0x3d   : > { %1801 = dma.done.wait (%p1915_p8), %s224_s26, 128  }
  0x3e   : > { %1803 = vsyncadd (%p1915_p8), %s224_s26, 4294967168  ;;  %v1833_v0 = vmov 0   ;;  %vm276_vm0 = vcmask 1041408   ;;  %v336_v1 = vld [vmem:[%s1985_s18] sm:$0xff]  ;;  %vm272_vm1 = vcmask 31744   ;;  %vm461_vm2 = vcmask 130048  }
  0x3f   : > { %402 = vmatprep.mubr.bf16.mxu1 %v1833_v0  ;;  %315 = vmatprep.mubr.bf16.mxu0 %v1833_v0  ;;  %v338_v2 = vcombine.high %v336_v1, %v336_v1  ;;  %v340_v3 = vpack.c.bf16 %v336_v1, %v336_v1  ;;  %v1523_v6 = vld [vmem:[%s2620_s1] sm:$0xff]   ;;  %v1525_v20 = vld [vmem:[%s2620_s1 + $0x8] sm:$0xff]   ;;  %s1315_s10 = sld [smem:[#allocation4]]  ;;  %s1456_s12 = sshll.u32 %s1822_s23, 7 }
  0x40   : > { %v1524_v7 = vld [vmem:[%s2621_s2] sm:$0xff]   ;;  %s253_s13 = scalar_lea.vmem [#allocation8], %s1423_s4  ;;  %s2570_s17 = scalar_lea.hbm %s2624_s5, %s1456_s12 }
  0x41   : > { %v341_v4 = vpack.c.bf16 %v338_v2, %v338_v2  ;;  %v365_v5 = vsel %vm276_vm0, %v340_v3, 0  ;;  %s1335_s14 = sshll.u32 %s253_s13, 4  ;;  %s1321_s6 = scalar_lea.sflag [#allocation7], %s1979_s16  ;;  %s2572_s14 = int_to_ptr.vmem [resolvable:$true] %s1335_s14 }
  0x42   : > { %p2720_p9 = scmp.ne.s32.totalorder %s2656_s7, 0  ;;  %s1834_s23 = smov [#allocation8]  }
  0x43   : > { %1430 = vmatprep.subr.msk.bf16.mxu1 %vm276_vm0, %v341_v4  ;;  %1426 = vmatprep.subr.msk.bf16.mxu0 %vm276_vm0, %v341_v4  ;;  %s1752_s4 = sshll.u32 %s1834_s23, 4  ;;  %s1753_s4 = int_to_ptr.vmem [resolvable:$false] %s1752_s4 }
  0x44   : > { %371 = vmatpush1.bf16.msra.mxu1 %v365_v5  ;;  %284 = vmatpush1.bf16.msra.mxu0 %v365_v5  ;;  %s1754_s19 = scalar_lea.vmem %s1753_s4, 256  ;;  %p1755_p7 = scmp.lt.s32.totalorder %s2572_s14, %s1753_s4 }
  0x47   : > { %1431 = vmatmul.mubr.msk.bf16.vlgmr.msra.gmra.mrb[0].mxu1 %vm272_vm1, %v1523_v6  ;;  %1427 = vmatmul.mubr.msk.bf16.vlgmr.msra.gmra.mrb[0].mxu0 %vm272_vm1, %v1524_v7 }
  0x48   : > { %542 = vmatprep.mubr.bf16.mxu0 %v1833_v0  ;;  %412 = vmatprep.mubr.bf16.mxu1 %v1833_v0 }
  0x4f   : > { %1432 = vmatmul.mubr.msk.bf16.gmra.mrb[4].mxu1 %vm272_vm1, %v1525_v20 }
  0x50   : > { %672 = vmatprep.mubr.bf16.mxu1 %v1833_v0 }
 0x11a   : > { %v404_v8 = vpop.f32.mrb[0].mxu1  ;;  %v317_v9 = vpop.f32.mrb[0].mxu0 }
 0x11b   : > { %v406_v10 = vpop.f32.mrb[1].mxu1  ;;  %v319_v11 = vpop.f32.mrb[1].mxu0 }
 0x11c   : > { %v408_v12 = vpop.f32.mrb[2].mxu1  ;;  %v321_v13 = vpop.f32.mrb[2].mxu0 }
 0x11d   : > { %v410_v14 = vpop.f32.mrb[3].mxu1  ;;  %v423_v15 = vpack.c.bf16 %v408_v12, %v404_v8  ;;  %v326_v16 = vpack.c.bf16 %v321_v13, %v317_v9  ;;  %v323_v17 = vpop.f32.mrb[3].mxu0 }
 0x11e   : > { %v424_v18 = vpack.c.bf16 %v410_v14, %v406_v10  ;;  %v327_v19 = vpack.c.bf16 %v323_v17, %v319_v11 }
 0x11f   : > { %429 = vxpose.xlu0.c.b16.start.end [1/1] (short) %v423_v15, 128 }
 0x120   : > { %510 = vmatprep.subr.bf16.mxu0 %v327_v19  ;;  %1457 = vmatprep.subr.bf16.mxu1 %v327_v19 }
 0x121   : > { %511 = vmatpush1.bf16.msra.mxu0 %v326_v16  ;;  %1458 = vmatpush1.bf16.msra.mxu1 %v326_v16 }
 0x122   : > { %v414_v37 = vpop.f32.mrb[4].mxu1 }
 0x123   : > { %v416_v38 = vpop.f32.mrb[5].mxu1 }
 0x124   : > { %v418_v39 = vpop.f32.mrb[6].mxu1 }
 0x125   : > { %v425_v40 = vpack.c.bf16 %v418_v39, %v414_v37  ;;  %v420_v41 = vpop.f32.mrb[7].mxu1 }
 0x126   : > { %v426_v42 = vpack.c.bf16 %v420_v41, %v416_v38 }
 0x128   : > { %1219 = vmatprep.subr.bf16.mxu1 %v426_v42 }
 0x13c   : > { %445 = vxpose.xlu0.c.b16.start.end [1/1] (short) %v424_v18, 128 }
 0x185   : > { %v437_v21 = vpop.trf.xlu0 }
 0x186   : > { %1433 = vmatmul.mubr.msk.bf16.vlgmr.msra.gmra.mrb[4].mxu0 %vm461_vm2, %v437_v21 }
 0x187   : > { %552 = vmatprep.mubr.bf16.mxu0 %v1833_v0 }
 0x189   : > { %v438_v22 = vpop.trf.xlu0 }
 0x18d   : > { %v439_v23 = vpop.trf.xlu0 }
 0x18e   : > { %1434 = vmatmul.mubr.msk.bf16.gmra.mrb[8].mxu0 %vm461_vm2, %v438_v22 }
 0x18f   : > { %562 = vmatprep.mubr.bf16.mxu0 %v1833_v0 }
 0x191   : > { %v440_v24 = vpop.trf.xlu0 }
 0x195   : > { %v441_v25 = vpop.trf.xlu0 }
 0x196   : > { %1435 = vmatmul.mubr.msk.bf16.gmra.mrb[12].mxu0 %vm461_vm2, %v439_v23 }
 0x197   : > { %572 = vmatprep.mubr.bf16.mxu0 %v1833_v0 }
 0x199   : > { %v442_v26 = vpop.trf.xlu0 }
 0x19d   : > { %v443_v27 = vpop.trf.xlu0 }
 0x19e   : > { %1436 = vmatmul.mubr.msk.bf16.gmra.mrb[16].mxu0 %vm461_vm2, %v440_v24 }
 0x19f   : > { %582 = vmatprep.mubr.bf16.mxu0 %v1833_v0 }
 0x1a1   : > { %v444_v28 = vpop.trf.xlu0 }
 0x1a5   : > { %v453_v29 = vpop.trf.xlu0 }
 0x1a6   : > { %1437 = vmatmul.mubr.msk.bf16.gmra.mrb[20].mxu0 %vm461_vm2, %v441_v25 }
 0x1a7   : > { %592 = vmatprep.mubr.bf16.mxu0 %v1833_v0 }
 0x1a9   : > { %v454_v30 = vpop.trf.xlu0 }
 0x1ad   : > { %v455_v31 = vpop.trf.xlu0 }
 0x1ae   : > { %1438 = vmatmul.mubr.msk.bf16.gmra.mrb[24].mxu0 %vm461_vm2, %v442_v26 }
 0x1af   : > { %602 = vmatprep.mubr.bf16.mxu0 %v1833_v0 }
 0x1b1   : > { %v456_v32 = vpop.trf.xlu0 }
 0x1b5   : > { %v457_v33 = vpop.trf.xlu0 }
 0x1b6   : > { %1439 = vmatmul.mubr.msk.bf16.gmra.mrb[28].mxu0 %vm461_vm2, %v443_v27 }
 0x1b7   : > { %612 = vmatprep.mubr.bf16.mxu0 %v1833_v0 }
 0x1b9   : > { %v458_v34 = vpop.trf.xlu0 }
 0x1ba   : > { %1446 = vmatmul.mubr.msk.bf16.vlgmr.msra.gmra.mrb[8].mxu1 %vm461_vm2, %v458_v34 }
 0x1bb   : > { %682 = vmatprep.mubr.bf16.mxu1 %v1833_v0  ;;  %1220 = vmatpush1.bf16.msra.mxu1 %v425_v40 }
 0x1bd   : > { %v459_v35 = vpop.trf.xlu0 }
 0x1be   : > { %1440 = vmatmul.mubr.msk.bf16.gmra.mrb[32].mxu0 %vm461_vm2, %v444_v28 }
 0x1bf   : > { %622 = vmatprep.mubr.bf16.mxu0 %v1833_v0 }
 0x1c1   : > { %v460_v36 = vpop.trf.xlu0 }
 0x1c2   : > { %1447 = vmatmul.mubr.msk.bf16.gmra.mrb[12].mxu1 %vm461_vm2, %v459_v35 }
 0x1c3   : > { %692 = vmatprep.mubr.bf16.mxu1 %v1833_v0 }
 0x1c6   : > { %1441 = vmatmul.mubr.msk.bf16.gmra.mrb[36].mxu0 %vm461_vm2, %v453_v29 }
 0x1c7   : > { %632 = vmatprep.mubr.bf16.mxu0 %v1833_v0 }
 0x1ca   : > { %1448 = vmatmul.mubr.msk.bf16.gmra.mrb[16].mxu1 %vm461_vm2, %v460_v36 }
 0x1cb   : > { %1251 = vmatprep.mubr.bf16.mxu1 %v1833_v0 }
 0x1ce   : > { %1442 = vmatmul.mubr.msk.bf16.gmra.mrb[40].mxu0 %vm461_vm2, %v454_v30 }
 0x1cf   : > { %642 = vmatprep.mubr.bf16.mxu0 %v1833_v0 }
 0x1d6   : > { %1443 = vmatmul.mubr.msk.bf16.gmra.mrb[44].mxu0 %vm461_vm2, %v455_v31 }
 0x1d7   : > { %652 = vmatprep.mubr.bf16.mxu0 %v1833_v0 }
 0x1de   : > { %1444 = vmatmul.mubr.msk.bf16.gmra.mrb[48].mxu0 %vm461_vm2, %v456_v32 }
 0x1df   : > { %662 = vmatprep.mubr.bf16.mxu0 %v1833_v0 }
 0x1e6   : > { %1445 = vmatmul.mubr.msk.bf16.gmra.mrb[52].mxu0 %vm461_vm2, %v457_v33 }
 0x259   : > { %v2040_v43 = vpop.f32.mrb[4].mxu0 }
 0x25a   : > { %v2042_v44 = vpop.f32.mrb[5].mxu0 }
 0x25b   : > { %v2044_v45 = vpop.f32.mrb[6].mxu0  ;;  %v703_v46 = vmax.f32 %v2040_v43, %v2042_v44 }
 0x25c   : > { %v2048_v47 = vpop.f32.mrb[7].mxu0 }
 0x25d   : > { %704 = vmax.xlane.f32.xlu1 %v703_v46  ;;  %v706_v48 = vmax.f32 %v2044_v45, %v2048_v47 }
 0x261   : > { %707 = vmax.xlane.f32.xlu1 %v706_v48  ;;  %v2052_v49 = vpop.f32.mrb[8].mxu0 }
 0x262   : > { %v2054_v50 = vpop.f32.mrb[9].mxu0 }
 0x263   : > { %v2056_v51 = vpop.f32.mrb[10].mxu0  ;;  %v709_v52 = vmax.f32 %v2052_v49, %v2054_v50 }
 0x264   : > { %v2060_v53 = vpop.f32.mrb[11].mxu0 }
 0x265   : > { %710 = vmax.xlane.f32.xlu1 %v709_v52  ;;  %v712_v54 = vmax.f32 %v2056_v51, %v2060_v53 }
 0x269   : > { %713 = vmax.xlane.f32.xlu1 %v712_v54  ;;  %v2064_v55 = vpop.f32.mrb[12].mxu0 }
 0x26a   : > { %v2066_v56 = vpop.f32.mrb[13].mxu0 }
 0x26b   : > { %v2068_v57 = vpop.f32.mrb[14].mxu0  ;;  %v715_v58 = vmax.f32 %v2064_v55, %v2066_v56 }
 0x26c   : > { %v2072_v59 = vpop.f32.mrb[15].mxu0 }
 0x26d   : > { %716 = vmax.xlane.f32.xlu1 %v715_v58  ;;  %v718_v60 = vmax.f32 %v2068_v57, %v2072_v59 }
 0x271   : > { %719 = vmax.xlane.f32.xlu1 %v718_v60  ;;  %v2076_v61 = vpop.f32.mrb[16].mxu0 }
 0x272   : > { %v2078_v62 = vpop.f32.mrb[17].mxu0 }
 0x273   : > { %v2080_v63 = vpop.f32.mrb[18].mxu0  ;;  %v721_v0 = vmax.f32 %v2076_v61, %v2078_v62 }
 0x274   : > { %v2084_v1 = vpop.f32.mrb[19].mxu0 }
 0x275   : > { %722 = vmax.xlane.f32.xlu1 %v721_v0  ;;  %v724_v2 = vmax.f32 %v2080_v63, %v2084_v1 }
 0x279   : > { %725 = vmax.xlane.f32.xlu1 %v724_v2  ;;  %v2088_v3 = vpop.f32.mrb[20].mxu0 }
 0x27a   : > { %v2090_v4 = vpop.f32.mrb[21].mxu0 }
 0x27b   : > { %v2092_v5 = vpop.f32.mrb[22].mxu0  ;;  %v727_v6 = vmax.f32 %v2088_v3, %v2090_v4 }
 0x27c   : > { %v2096_v7 = vpop.f32.mrb[23].mxu0 }
 0x27d   : > { %728 = vmax.xlane.f32.xlu1 %v727_v6  ;;  %v730_v8 = vmax.f32 %v2092_v5, %v2096_v7 }
 0x27f   : > { %731 = vmax.xlane.f32.xlu0 %v730_v8 }
 0x281   : > { %v2100_v9 = vpop.f32.mrb[24].mxu0 }
 0x282   : > { %v2102_v10 = vpop.f32.mrb[25].mxu0 }
 0x283   : > { %v2104_v11 = vpop.f32.mrb[26].mxu0  ;;  %v733_v12 = vmax.f32 %v2100_v9, %v2102_v10 }
 0x284   : > { %v2108_v13 = vpop.f32.mrb[27].mxu0 }
 0x285   : > { %734 = vmax.xlane.f32.xlu1 %v733_v12  ;;  %v736_v14 = vmax.f32 %v2104_v11, %v2108_v13 }
 0x289   : > { %737 = vmax.xlane.f32.xlu1 %v736_v14  ;;  %v2112_v15 = vpop.f32.mrb[28].mxu0 }
 0x28a   : > { %v2114_v16 = vpop.f32.mrb[29].mxu0 }
 0x28b   : > { %v2116_v17 = vpop.f32.mrb[30].mxu0  ;;  %v739_v18 = vmax.f32 %v2112_v15, %v2114_v16 }
 0x28c   : > { %v2120_v19 = vpop.f32.mrb[31].mxu0 }
 0x28d   : > { %740 = vmax.xlane.f32.xlu1 %v739_v18  ;;  %v742_v20 = vmax.f32 %v2116_v17, %v2120_v19  ;;  %v2124_v21 = vpop.f32.mrb[8].mxu1 }
 0x28e   : > { %v2126_v22 = vpop.f32.mrb[9].mxu1 }
 0x28f   : > { %v2128_v23 = vpop.f32.mrb[10].mxu1 }
 0x290   : > { %2661 = vst [vmem:[#allocation11_spill] sm:$0xff] %v2128_v23  ;;  %v2132_v25 = vpop.f32.mrb[11].mxu1 }
 0x291   : > { %2662 = vst [vmem:[#allocation12_spill] sm:$0xff] %v2132_v25  ;;  %743 = vmax.xlane.f32.xlu1 %v742_v20  ;;  %v2134_v26 = vpop.f32.mrb[32].mxu0  ;;  %v784_v27 = vmax.f32 %v2128_v23, %v2132_v25 }
 0x292   : > { %v2138_v28 = vpop.f32.mrb[33].mxu0 }
 0x293   : > { %v2140_v29 = vpop.f32.mrb[34].mxu0  ;;  %v745_v30 = vmax.f32 %v2134_v26, %v2138_v28 }
 0x294   : > { %v2144_v31 = vpop.f32.mrb[35].mxu0 }
 0x295   : > { %746 = vmax.xlane.f32.xlu1 %v745_v30  ;;  %v748_v32 = vmax.f32 %v2140_v29, %v2144_v31  ;;  %v2148_v33 = vpop.f32.mrb[12].mxu1 }
 0x296   : > { %2663 = vst [vmem:[#allocation13_spill] sm:$0xff] %v2148_v33  ;;  %v2150_v34 = vpop.f32.mrb[13].mxu1 }
 0x297   : > { %2664 = vst [vmem:[#allocation14_spill] sm:$0xff] %v2150_v34  ;;  %v2152_v35 = vpop.f32.mrb[14].mxu1  ;;  %v787_v36 = vmax.f32 %v2148_v33, %v2150_v34 }
 0x298   : > { %2665 = vst [vmem:[#allocation15_spill] sm:$0xff] %v2152_v35  ;;  %v2156_v37 = vpop.f32.mrb[15].mxu1 }
 0x299   : > { %2666 = vst [vmem:[#allocation16_spill] sm:$0xff] %v2156_v37  ;;  %749 = vmax.xlane.f32.xlu1 %v748_v32  ;;  %v2158_v38 = vpop.f32.mrb[36].mxu0  ;;  %v790_v39 = vmax.f32 %v2152_v35, %v2156_v37 }
 0x29a   : > { %v2162_v40 = vpop.f32.mrb[37].mxu0 }
 0x29b   : > { %v2164_v41 = vpop.f32.mrb[38].mxu0  ;;  %v751_v42 = vmax.f32 %v2158_v38, %v2162_v40 }
 0x29c   : > { %v2168_v46 = vpop.f32.mrb[39].mxu0 }
 0x29d   : > { %752 = vmax.xlane.f32.xlu1 %v751_v42  ;;  %v754_v48 = vmax.f32 %v2164_v41, %v2168_v46  ;;  %v2172_v52 = vpop.f32.mrb[16].mxu1 }
 0x29e   : > { %2667 = vst [vmem:[#allocation17_spill] sm:$0xff] %v2172_v52  ;;  %v2174_v54 = vpop.f32.mrb[17].mxu1 }
 0x29f   : > { %2668 = vst [vmem:[#allocation18_spill] sm:$0xff] %v2174_v54  ;;  %v2176_v58 = vpop.f32.mrb[18].mxu1  ;;  %v793_v60 = vmax.f32 %v2172_v52, %v2174_v54 }
 0x2a0   : > { %2669 = vst [vmem:[#allocation19_spill] sm:$0xff] %v2176_v58  ;;  %v2180_v0 = vpop.f32.mrb[19].mxu1 }
 0x2a1   : > { %2670 = vst [vmem:[#allocation20_spill] sm:$0xff] %v2180_v0  ;;  %755 = vmax.xlane.f32.xlu1 %v754_v48  ;;  %v2182_v2 = vpop.f32.mrb[40].mxu0  ;;  %v796_v6 = vmax.f32 %v2176_v58, %v2180_v0 }
 0x2a2   : > { %v2186_v8 = vpop.f32.mrb[41].mxu0 }
 0x2a3   : > { %v2188_v12 = vpop.f32.mrb[42].mxu0  ;;  %v757_v14 = vmax.f32 %v2182_v2, %v2186_v8 }
 0x2a4   : > { %v2192_v18 = vpop.f32.mrb[43].mxu0 }
 0x2a5   : > { %758 = vmax.xlane.f32.xlu1 %v757_v14  ;;  %v760_v20 = vmax.f32 %v2188_v12, %v2192_v18  ;;  %v1215_v14 = vld [vmem:[%s2622_s3] sm:$0x3] }
 0x2a6   : > { %1449 = vmatmul.mubr.msk.bf16.vlgmr.msra.gmra.mrb[20].mxu1 %vm461_vm2, %v1215_v14 }
 0x2a9   : > { %761 = vmax.xlane.f32.xlu1 %v760_v20  ;;  %v2196_v30 = vpop.f32.mrb[44].mxu0 }
 0x2aa   : > { %v2198_v32 = vpop.f32.mrb[45].mxu0 }
 0x2ab   : > { %v2200_v42 = vpop.f32.mrb[46].mxu0  ;;  %v763_v48 = vmax.f32 %v2196_v30, %v2198_v32 }
 0x2ac   : > { %v2204_v24 = vpop.f32.mrb[47].mxu0 }
 0x2ad   : > { %764 = vmax.xlane.f32.xlu0 %v763_v48  ;;  %v766_v0 = vmax.f32 %v2200_v42, %v2204_v24 }
 0x2af   : > { %767 = vmax.xlane.f32.xlu1 %v766_v0 }
 0x2b1   : > { %v2211_v20 = vpop.f32.mrb[48].mxu0 }
 0x2b2   : > { %v2214_v58 = vpop.f32.mrb[49].mxu0 }
 0x2b3   : > { %v2216_v54 = vpop.f32.mrb[50].mxu0  ;;  %v769_v52 = vmax.f32 %v2211_v20, %v2214_v58 }
 0x2b4   : > { %2671 = vst [vmem:[#allocation21_spill] sm:$0xff] %v2216_v54  ;;  %v2220_v48 = vpop.f32.mrb[51].mxu0 }
 0x2b5   : > { %2672 = vst [vmem:[#allocation22_spill] sm:$0xff] %v2220_v48  ;;  %770 = vmax.xlane.f32.xlu0 %v769_v52  ;;  %v772_v0 = vmax.f32 %v2216_v54, %v2220_v48  ;;  %v2675_v52 = vmax.f32 %v2124_v21, %v2126_v22 }
 0x2b7   : > { %773 = vmax.xlane.f32.xlu1 %v772_v0 }
 0x2b9   : > { %v2224_v37 = vpop.f32.mrb[52].mxu0 }
 0x2ba   : > { %2673 = vst [vmem:[#allocation23_spill] sm:$0xff] %v2224_v37  ;;  %v2226_v35 = vpop.f32.mrb[53].mxu0 }
 0x2bb   : > { %2674 = vst [vmem:[#allocation24_spill] sm:$0xff] %v2226_v35  ;;  %v2228_v34 = vpop.f32.mrb[54].mxu0  ;;  %v775_v14 = vmax.f32 %v2224_v37, %v2226_v35 }
 0x2bc   : > { %v2232_v33 = vpop.f32.mrb[55].mxu0 }
 0x2bd   : > { %v778_v25 = vmax.f32 %v2228_v34, %v2232_v33  ;;  %776 = vmax.xlane.f32.xlu0 %v775_v14 }
 0x2bf   : > { %779 = vmax.xlane.f32.xlu1 %v778_v25 }
 0x2c1   : > { %782 = vmax.xlane.f32.xlu0 %v2675_v52 }
 0x2c3   : > { %785 = vmax.xlane.f32.xlu1 %v784_v27 }
 0x2c5   : > { %788 = vmax.xlane.f32.xlu0 %v787_v36 }
 0x2c7   : > { %791 = vmax.xlane.f32.xlu1 %v790_v39 }
 0x2c9   : > { %794 = vmax.xlane.f32.xlu0 %v793_v60 }
 0x2cb   : > { %797 = vmax.xlane.f32.xlu1 %v796_v6 }
 0x2ea   : > { %v705_v0 = vpop.xlane.xlu1 %704 }
 0x2eb   : > { %v799_v23 = vsub.f32 %v2040_v43, %v705_v0  ;;  %v800_v35 = vsub.f32 %v2042_v44, %v705_v0 }
 0x2ed   : > { %v863_v37 = vmul.f32 1.442695, %v799_v23  ;;  %v865_v48 = vmul.f32 1.442695, %v800_v35 }
 0x2ee   : > { %v708_v54 = vpop.xlane.xlu1 %707 }
 0x2ef   : > { %1526 = vpow2.f32 %v863_v37  ;;  %v801_v25 = vsub.f32 %v2044_v45, %v708_v54  ;;  %v802_v14 = vsub.f32 %v2048_v47, %v708_v54 }
 0x2f0   : > { %1528 = vpow2.f32 %v865_v48 }
 0x2f1   : > { %v867_v52 = vmul.f32 1.442695, %v801_v25  ;;  %v869_v27 = vmul.f32 1.442695, %v802_v14 }
 0x2f2   : > { %v711_v36 = vpop.xlane.xlu1 %710 }
 0x2f3   : > { %1530 = vpow2.f32 %v867_v52  ;;  %v803_v39 = vsub.f32 %v2052_v49, %v711_v36  ;;  %v804_v60 = vsub.f32 %v2054_v50, %v711_v36 }
 0x2f4   : > { %1532 = vpow2.f32 %v869_v27 }
 0x2f5   : > { %v871_v43 = vmul.f32 1.442695, %v803_v39  ;;  %v873_v44 = vmul.f32 1.442695, %v804_v60 }
 0x2f6   : > { %v714_v23 = vpop.xlane.xlu1 %713 }
 0x2f7   : > { %1534 = vpow2.f32 %v871_v43  ;;  %v805_v35 = vsub.f32 %v2056_v51, %v714_v23  ;;  %v806_v45 = vsub.f32 %v2060_v53, %v714_v23 }
 0x2f8   : > { %1536 = vpow2.f32 %v873_v44 }
 0x2f9   : > { %v2247_v47 = vpop.eup %1526  ;;  %v875_v37 = vmul.f32 1.442695, %v805_v35  ;;  %v877_v54 = vmul.f32 1.442695, %v806_v45 }
 0x2fa   : > { %v2249_v6 = vpop.eup %1528  ;;  %v717_v48 = vpop.xlane.xlu1 %716 }
 0x2fb   : > { %1538 = vpow2.f32 %v875_v37  ;;  %v807_v49 = vsub.f32 %v2064_v55, %v717_v48  ;;  %v808_v50 = vsub.f32 %v2066_v56, %v717_v48  ;;  %v991_v0 = vadd.f32 %v2249_v6, %v2247_v47 }
 0x2fc   : > { %1540 = vpow2.f32 %v877_v54 }
 0x2fd   : > { %v2255_v51 = vpop.eup %1530  ;;  %v879_v53 = vmul.f32 1.442695, %v807_v49  ;;  %v881_v25 = vmul.f32 1.442695, %v808_v50  ;;  %992 = vadd.xlane.f32.xlu0 %v991_v0 }
 0x2fe   : > { %v2257_v14 = vpop.eup %1532  ;;  %v720_v52 = vpop.xlane.xlu1 %719 }
 0x2ff   : > { %1542 = vpow2.f32 %v879_v53  ;;  %v809_v27 = vsub.f32 %v2068_v57, %v720_v52  ;;  %v810_v36 = vsub.f32 %v2072_v59, %v720_v52  ;;  %v994_v55 = vadd.f32 %v2257_v14, %v2255_v51 }
 0x300   : > { %1544 = vpow2.f32 %v881_v25 }
 0x301   : > { %v2263_v56 = vpop.eup %1534  ;;  %v883_v39 = vmul.f32 1.442695, %v809_v27  ;;  %v885_v60 = vmul.f32 1.442695, %v810_v36  ;;  %995 = vadd.xlane.f32.xlu1 %v994_v55 }
 0x302   : > { %v2265_v43 = vpop.eup %1536  ;;  %v723_v44 = vpop.xlane.xlu1 %722 }
 0x303   : > { %1546 = vpow2.f32 %v883_v39  ;;  %v811_v23 = vsub.f32 %v2076_v61, %v723_v44  ;;  %v812_v35 = vsub.f32 %v2078_v62, %v723_v44  ;;  %v997_v57 = vadd.f32 %v2265_v43, %v2263_v56 }
 0x304   : > { %1548 = vpow2.f32 %v885_v60 }
 0x305   : > { %v2271_v59 = vpop.eup %1538  ;;  %v887_v45 = vmul.f32 1.442695, %v811_v23  ;;  %v889_v37 = vmul.f32 1.442695, %v812_v35  ;;  %998 = vadd.xlane.f32.xlu0 %v997_v57 }
 0x306   : > { %v2273_v54 = vpop.eup %1540  ;;  %v726_v48 = vpop.xlane.xlu1 %725 }
 0x307   : > { %1550 = vpow2.f32 %v887_v45  ;;  %v813_v49 = vsub.f32 %v2080_v63, %v726_v48  ;;  %v814_v50 = vsub.f32 %v2084_v1, %v726_v48  ;;  %v1000_v61 = vadd.f32 %v2273_v54, %v2271_v59 }
 0x308   : > { %1552 = vpow2.f32 %v889_v37 }
 0x309   : > { %v2279_v62 = vpop.eup %1542  ;;  %v891_v0 = vmul.f32 1.442695, %v813_v49  ;;  %v893_v53 = vmul.f32 1.442695, %v814_v50  ;;  %1001 = vadd.xlane.f32.xlu1 %v1000_v61 }
 0x30a   : > { %v2281_v25 = vpop.eup %1544  ;;  %v729_v52 = vpop.xlane.xlu1 %728 }
 0x30b   : > { %1554 = vpow2.f32 %v891_v0  ;;  %v815_v27 = vsub.f32 %v2088_v3, %v729_v52  ;;  %v816_v36 = vsub.f32 %v2090_v4, %v729_v52  ;;  %v1003_v63 = vadd.f32 %v2281_v25, %v2279_v62 }
 0x30c   : > { %1556 = vpow2.f32 %v893_v53  ;;  %v732_v1 = vpop.xlane.xlu0 %731 }
 0x30d   : > { %v2287_v55 = vpop.eup %1546  ;;  %v895_v39 = vmul.f32 1.442695, %v815_v27  ;;  %v897_v60 = vmul.f32 1.442695, %v816_v36  ;;  %v817_v44 = vsub.f32 %v2092_v5, %v732_v1  ;;  %v818_v23 = vsub.f32 %v2096_v7, %v732_v1  ;;  %1004 = vadd.xlane.f32.xlu0 %v1003_v63 }
 0x30e   : > { %v2291_v35 = vpop.eup %1548 }
 0x30f   : > { %1558 = vpow2.f32 %v895_v39  ;;  %v899_v3 = vmul.f32 1.442695, %v817_v44  ;;  %v901_v57 = vmul.f32 1.442695, %v818_v23  ;;  %v1006_v4 = vadd.f32 %v2291_v35, %v2287_v55 }
 0x310   : > { %1560 = vpow2.f32 %v897_v60 }
 0x311   : > { %v2295_v45 = vpop.eup %1550  ;;  %1562 = vpow2.f32 %v899_v3  ;;  %1007 = vadd.xlane.f32.xlu1 %v1006_v4 }
 0x312   : > { %v2297_v37 = vpop.eup %1552  ;;  %1564 = vpow2.f32 %v901_v57  ;;  %v735_v5 = vpop.xlane.xlu1 %734 }
 0x313   : > { %v819_v7 = vsub.f32 %v2100_v9, %v735_v5  ;;  %v820_v48 = vsub.f32 %v2102_v10, %v735_v5  ;;  %v1009_v49 = vadd.f32 %v2297_v37, %v2295_v45 }
 0x315   : > { %v2303_v50 = vpop.eup %1554  ;;  %v903_v61 = vmul.f32 1.442695, %v819_v7  ;;  %v905_v0 = vmul.f32 1.442695, %v820_v48  ;;  %1010 = vadd.xlane.f32.xlu0 %v1009_v49 }
 0x316   : > { %v2305_v53 = vpop.eup %1556  ;;  %v738_v52 = vpop.xlane.xlu1 %737 }
 0x317   : > { %1566 = vpow2.f32 %v903_v61  ;;  %v821_v27 = vsub.f32 %v2104_v11, %v738_v52  ;;  %v822_v36 = vsub.f32 %v2108_v13, %v738_v52  ;;  %v1012_v9 = vadd.f32 %v2305_v53, %v2303_v50 }
 0x318   : > { %1568 = vpow2.f32 %v905_v0 }
 0x319   : > { %v2311_v10 = vpop.eup %1558  ;;  %v907_v63 = vmul.f32 1.442695, %v821_v27  ;;  %v909_v1 = vmul.f32 1.442695, %v822_v36  ;;  %1013 = vadd.xlane.f32.xlu1 %v1012_v9 }
 0x31a   : > { %v2313_v39 = vpop.eup %1560  ;;  %v741_v60 = vpop.xlane.xlu1 %740 }
 0x31b   : > { %v2315_v44 = vpop.eup %1562  ;;  %1570 = vpow2.f32 %v907_v63  ;;  %v823_v23 = vsub.f32 %v2112_v15, %v741_v60  ;;  %v824_v11 = vsub.f32 %v2114_v16, %v741_v60  ;;  %v1015_v13 = vadd.f32 %v2313_v39, %v2311_v10 }
 0x31c   : > { %v2321_v3 = vpop.eup %1564  ;;  %1572 = vpow2.f32 %v909_v1 }
 0x31d   : > { %v911_v57 = vmul.f32 1.442695, %v823_v23  ;;  %v913_v4 = vmul.f32 1.442695, %v824_v11  ;;  %1016 = vadd.xlane.f32.xlu0 %v1015_v13  ;;  %v1018_v5 = vadd.f32 %v2321_v3, %v2315_v44 }
 0x31e   : > { %v744_v7 = vpop.xlane.xlu1 %743 }
 0x31f   : > { %1574 = vpow2.f32 %v911_v57  ;;  %v825_v48 = vsub.f32 %v2116_v17, %v744_v7  ;;  %v826_v15 = vsub.f32 %v2120_v19, %v744_v7  ;;  %1019 = vadd.xlane.f32.xlu1 %v1018_v5 }
 0x320   : > { %1576 = vpow2.f32 %v913_v4 }
 0x321   : > { %v2327_v16 = vpop.eup %1566  ;;  %v915_v49 = vmul.f32 1.442695, %v825_v48  ;;  %v917_v61 = vmul.f32 1.442695, %v826_v15 }
 0x322   : > { %v2329_v0 = vpop.eup %1568  ;;  %v747_v52 = vpop.xlane.xlu1 %746 }
 0x323   : > { %1578 = vpow2.f32 %v915_v49  ;;  %v827_v27 = vsub.f32 %v2134_v26, %v747_v52  ;;  %v828_v36 = vsub.f32 %v2138_v28, %v747_v52  ;;  %v1021_v9 = vadd.f32 %v2329_v0, %v2327_v16 }
 0x324   : > { %1580 = vpow2.f32 %v917_v61 }
 0x325   : > { %v2335_v17 = vpop.eup %1570  ;;  %v919_v19 = vmul.f32 1.442695, %v827_v27  ;;  %v921_v63 = vmul.f32 1.442695, %v828_v36  ;;  %1022 = vadd.xlane.f32.xlu0 %v1021_v9 }
 0x326   : > { %v2337_v1 = vpop.eup %1572  ;;  %v750_v60 = vpop.xlane.xlu1 %749 }
 0x327   : > { %1582 = vpow2.f32 %v919_v19  ;;  %v829_v23 = vsub.f32 %v2140_v29, %v750_v60  ;;  %v830_v11 = vsub.f32 %v2144_v31, %v750_v60  ;;  %v1024_v26 = vadd.f32 %v2337_v1, %v2335_v17 }
 0x328   : > { %1584 = vpow2.f32 %v921_v63 }
 0x329   : > { %v2343_v28 = vpop.eup %1574  ;;  %v923_v13 = vmul.f32 1.442695, %v829_v23  ;;  %v925_v57 = vmul.f32 1.442695, %v830_v11  ;;  %1025 = vadd.xlane.f32.xlu1 %v1024_v26 }
 0x32a   : > { %v2345_v4 = vpop.eup %1576  ;;  %v753_v5 = vpop.xlane.xlu1 %752 }
 0x32b   : > { %1586 = vpow2.f32 %v923_v13  ;;  %v831_v7 = vsub.f32 %v2158_v38, %v753_v5  ;;  %v832_v48 = vsub.f32 %v2162_v40, %v753_v5  ;;  %v1027_v29 = vadd.f32 %v2345_v4, %v2343_v28 }
 0x32c   : > { %1588 = vpow2.f32 %v925_v57 }
 0x32d   : > { %v2351_v31 = vpop.eup %1578  ;;  %v927_v15 = vmul.f32 1.442695, %v831_v7  ;;  %v929_v49 = vmul.f32 1.442695, %v832_v48  ;;  %1028 = vadd.xlane.f32.xlu0 %v1027_v29 }
 0x32e   : > { %v2353_v61 = vpop.eup %1580  ;;  %v756_v52 = vpop.xlane.xlu1 %755 }
 0x32f   : > { %1590 = vpow2.f32 %v927_v15  ;;  %v833_v27 = vsub.f32 %v2164_v41, %v756_v52  ;;  %v834_v36 = vsub.f32 %v2168_v46, %v756_v52  ;;  %v1030_v38 = vadd.f32 %v2353_v61, %v2351_v31 }
 0x330   : > { %1592 = vpow2.f32 %v929_v49 }
 0x331   : > { %v2359_v40 = vpop.eup %1582  ;;  %v931_v9 = vmul.f32 1.442695, %v833_v27  ;;  %v933_v19 = vmul.f32 1.442695, %v834_v36  ;;  %1031 = vadd.xlane.f32.xlu1 %v1030_v38 }
 0x332   : > { %v2361_v63 = vpop.eup %1584  ;;  %v759_v60 = vpop.xlane.xlu1 %758 }
 0x333   : > { %1594 = vpow2.f32 %v931_v9  ;;  %v835_v23 = vsub.f32 %v2182_v2, %v759_v60  ;;  %v836_v11 = vsub.f32 %v2186_v8, %v759_v60  ;;  %v1033_v41 = vadd.f32 %v2361_v63, %v2359_v40 }
 0x334   : > { %1596 = vpow2.f32 %v933_v19 }
 0x335   : > { %v2367_v46 = vpop.eup %1586  ;;  %v935_v26 = vmul.f32 1.442695, %v835_v23  ;;  %v937_v13 = vmul.f32 1.442695, %v836_v11  ;;  %1034 = vadd.xlane.f32.xlu0 %v1033_v41 }
 0x336   : > { %v2369_v57 = vpop.eup %1588  ;;  %v762_v5 = vpop.xlane.xlu1 %761 }
 0x337   : > { %1598 = vpow2.f32 %v935_v26  ;;  %v837_v7 = vsub.f32 %v2188_v12, %v762_v5  ;;  %v838_v48 = vsub.f32 %v2192_v18, %v762_v5  ;;  %v1036_v2 = vadd.f32 %v2369_v57, %v2367_v46 }
 0x338   : > { %1600 = vpow2.f32 %v937_v13 }
 0x339   : > { %v2375_v8 = vpop.eup %1590  ;;  %v939_v29 = vmul.f32 1.442695, %v837_v7  ;;  %v941_v15 = vmul.f32 1.442695, %v838_v48  ;;  %1037 = vadd.xlane.f32.xlu1 %v1036_v2 }
 0x33a   : > { %v2377_v49 = vpop.eup %1592  ;;  %v765_v52 = vpop.xlane.xlu0 %764 }
 0x33b   : > { %1602 = vpow2.f32 %v939_v29  ;;  %v839_v27 = vsub.f32 %v2196_v30, %v765_v52  ;;  %v840_v36 = vsub.f32 %v2198_v32, %v765_v52  ;;  %v1039_v12 = vadd.f32 %v2377_v49, %v2375_v8  ;;  %v2676_v52 = vld [vmem:[#allocation21_spill] sm:$0xff] }
 0x33c   : > { %1604 = vpow2.f32 %v941_v15  ;;  %v768_v18 = vpop.xlane.xlu1 %767 }
 0x33d   : > { %v2383_v38 = vpop.eup %1594  ;;  %v943_v9 = vmul.f32 1.442695, %v839_v27  ;;  %v945_v19 = vmul.f32 1.442695, %v840_v36  ;;  %v841_v60 = vsub.f32 %v2200_v42, %v768_v18  ;;  %v842_v23 = vsub.f32 %v2204_v24, %v768_v18  ;;  %1040 = vadd.xlane.f32.xlu0 %v1039_v12  ;;  %v2677_v36 = vld [vmem:[#allocation22_spill] sm:$0xff] }
 0x33e   : > { %v2387_v11 = vpop.eup %1596 }
 0x33f   : > { %1606 = vpow2.f32 %v943_v9  ;;  %v947_v30 = vmul.f32 1.442695, %v841_v60  ;;  %v949_v41 = vmul.f32 1.442695, %v842_v23  ;;  %v1042_v32 = vadd.f32 %v2387_v11, %v2383_v38 }
 0x340   : > { %1608 = vpow2.f32 %v945_v19 }
 0x341   : > { %v2391_v26 = vpop.eup %1598  ;;  %1610 = vpow2.f32 %v947_v30  ;;  %1043 = vadd.xlane.f32.xlu1 %v1042_v32 }
 0x342   : > { %v2393_v13 = vpop.eup %1600  ;;  %1612 = vpow2.f32 %v949_v41  ;;  %v771_v42 = vpop.xlane.xlu0 %770  ;;  %v2680_v41 = vld [vmem:[#allocation23_spill] sm:$0xff] }
 0x343   : > { %v843_v24 = vsub.f32 %v2211_v20, %v771_v42  ;;  %v844_v5 = vsub.f32 %v2214_v58, %v771_v42  ;;  %v1045_v7 = vadd.f32 %v2393_v13, %v2391_v26  ;;  %v2681_v42 = vld [vmem:[#allocation24_spill] sm:$0xff] }
 0x344   : > { %v774_v48 = vpop.xlane.xlu1 %773 }
 0x345   : > { %v2399_v2 = vpop.eup %1602  ;;  %v951_v29 = vmul.f32 1.442695, %v843_v24  ;;  %v953_v15 = vmul.f32 1.442695, %v844_v5  ;;  %v845_v27 = vsub.f32 %v2676_v52, %v774_v48  ;;  %v846_v12 = vsub.f32 %v2677_v36, %v774_v48  ;;  %1046 = vadd.xlane.f32.xlu0 %v1045_v7 }
 0x346   : > { %v2403_v18 = vpop.eup %1604 }
 0x347   : > { %1614 = vpow2.f32 %v951_v29  ;;  %v955_v9 = vmul.f32 1.442695, %v845_v27  ;;  %v957_v20 = vmul.f32 1.442695, %v846_v12  ;;  %v1048_v58 = vadd.f32 %v2403_v18, %v2399_v2 }
 0x348   : > { %1616 = vpow2.f32 %v953_v15 }
 0x349   : > { %v2407_v19 = vpop.eup %1606  ;;  %1618 = vpow2.f32 %v955_v9  ;;  %1049 = vadd.xlane.f32.xlu1 %v1048_v58 }
 0x34a   : > { %2678 = vst [vmem:[#allocation21_spill] sm:$0xff] %v2407_v19  ;;  %v2409_v60 = vpop.eup %1608  ;;  %1620 = vpow2.f32 %v957_v20  ;;  %v777_v23 = vpop.xlane.xlu0 %776 }
 0x34b   : > { %v2411_v30 = vpop.eup %1610  ;;  %v847_v32 = vsub.f32 %v2680_v41, %v777_v23  ;;  %v848_v24 = vsub.f32 %v2681_v42, %v777_v23  ;;  %v1051_v5 = vadd.f32 %v2409_v60, %v2407_v19  ;;  %v2683_v42 = vld [vmem:[#allocation11_spill] sm:$0xff] }
 0x34c   : > { %2679 = vst [vmem:[#allocation22_spill] sm:$0xff] %v2411_v30  ;;  %v2417_v7 = vpop.eup %1612  ;;  %v780_v48 = vpop.xlane.xlu1 %779 }
 0x34d   : > { %v959_v29 = vmul.f32 1.442695, %v847_v32  ;;  %v961_v15 = vmul.f32 1.442695, %v848_v24  ;;  %1052 = vadd.xlane.f32.xlu0 %v1051_v5  ;;  %v849_v52 = vsub.f32 %v2228_v34, %v780_v48  ;;  %v850_v27 = vsub.f32 %v2232_v33, %v780_v48  ;;  %v2684_v24 = vld [vmem:[#allocation12_spill] sm:$0xff] }
 0x34e   : > { %v783_v36 = vpop.xlane.xlu0 %782  ;;  %v1054_v12 = vadd.f32 %v2417_v7, %v2411_v30  ;;  %v2689_v30 = vld [vmem:[#allocation16_spill] sm:$0xff] }
 0x34f   : > { %1622 = vpow2.f32 %v959_v29  ;;  %v963_v9 = vmul.f32 1.442695, %v849_v52  ;;  %v965_v20 = vmul.f32 1.442695, %v850_v27  ;;  %v851_v58 = vsub.f32 %v2124_v21, %v783_v36 }
 0x350   : > { %1624 = vpow2.f32 %v961_v15  ;;  %v852_v23 = vsub.f32 %v2126_v22, %v783_v36  ;;  %1055 = vadd.xlane.f32.xlu1 %v1054_v12  ;;  %v786_v41 = vpop.xlane.xlu1 %785  ;;  %v2686_v15 = vld [vmem:[#allocation13_spill] sm:$0xff] }
 0x351   : > { %v2425_v32 = vpop.eup %1614  ;;  %1626 = vpow2.f32 %v963_v9  ;;  %v967_v34 = vmul.f32 1.442695, %v851_v58  ;;  %v853_v33 = vsub.f32 %v2683_v42, %v786_v41  ;;  %v854_v5 = vsub.f32 %v2684_v24, %v786_v41  ;;  %v2687_v9 = vld [vmem:[#allocation14_spill] sm:$0xff] }
 0x352   : > { %2682 = vst [vmem:[#allocation23_spill] sm:$0xff] %v2425_v32  ;;  %v2429_v48 = vpop.eup %1616  ;;  %1628 = vpow2.f32 %v965_v20  ;;  %v969_v29 = vmul.f32 1.442695, %v852_v23  ;;  %v789_v52 = vpop.xlane.xlu0 %788  ;;  %v2688_v23 = vld [vmem:[#allocation15_spill] sm:$0xff] }
 0x353   : > { %2685 = vst [vmem:[#allocation24_spill] sm:$0xff] %v2429_v48  ;;  %v2431_v27 = vpop.eup %1618  ;;  %1630 = vpow2.f32 %v967_v34  ;;  %v971_v21 = vmul.f32 1.442695, %v853_v33  ;;  %v973_v22 = vmul.f32 1.442695, %v854_v5  ;;  %v855_v36 = vsub.f32 %v2686_v15, %v789_v52  ;;  %v2690_v15 = vld [vmem:[#allocation17_spill] sm:$0xff] }
 0x354   : > { %v2434_v12 = vpop.eup %1620  ;;  %1632 = vpow2.f32 %v969_v29  ;;  %v856_v58 = vsub.f32 %v2687_v9, %v789_v52  ;;  %v1057_v41 = vadd.f32 %v2429_v48, %v2425_v32  ;;  %v792_v42 = vpop.xlane.xlu1 %791  ;;  %v2691_v32 = vld [vmem:[#allocation18_spill] sm:$0xff] }
 0x355   : > { %1634 = vpow2.f32 %v971_v21  ;;  %v975_v20 = vmul.f32 1.442695, %v855_v36  ;;  %v857_v24 = vsub.f32 %v2688_v23, %v792_v42  ;;  %v858_v19 = vsub.f32 %v2689_v30, %v792_v42 }
 0x356   : > { %1636 = vpow2.f32 %v973_v22  ;;  %v977_v34 = vmul.f32 1.442695, %v856_v58  ;;  %1058 = vadd.xlane.f32.xlu0 %v1057_v41  ;;  %v795_v33 = vpop.xlane.xlu0 %794  ;;  %v1060_v5 = vadd.f32 %v2434_v12, %v2431_v27  ;;  %v2692_v22 = vld [vmem:[#allocation19_spill] sm:$0xff]  ;;  %v2693_v41 = vld [vmem:[#allocation20_spill] sm:$0xff] }
 0x357   : > { %1638 = vpow2.f32 %v975_v20  ;;  %v979_v29 = vmul.f32 1.442695, %v857_v24  ;;  %v981_v52 = vmul.f32 1.442695, %v858_v19  ;;  %v859_v9 = vsub.f32 %v2690_v15, %v795_v33 }
 0x358   : > { %1640 = vpow2.f32 %v977_v34  ;;  %v860_v21 = vsub.f32 %v2691_v32, %v795_v33  ;;  %1061 = vadd.xlane.f32.xlu1 %v1060_v5  ;;  %v798_v36 = vpop.xlane.xlu1 %797 }
 0x359   : > { %v2445_v23 = vpop.eup %1622  ;;  %1642 = vpow2.f32 %v979_v29  ;;  %v983_v30 = vmul.f32 1.442695, %v859_v9  ;;  %v861_v58 = vsub.f32 %v2692_v22, %v798_v36  ;;  %v862_v42 = vsub.f32 %v2693_v41, %v798_v36 }
 0x35a   : > { %v2449_v48 = vpop.eup %1624  ;;  %1644 = vpow2.f32 %v981_v52  ;;  %v985_v20 = vmul.f32 1.442695, %v860_v21 }
 0x35b   : > { %v2451_v19 = vpop.eup %1626  ;;  %1646 = vpow2.f32 %v983_v30  ;;  %v987_v24 = vmul.f32 1.442695, %v861_v58  ;;  %v989_v34 = vmul.f32 1.442695, %v862_v42  ;;  %v1063_v32 = vadd.f32 %v2449_v48, %v2445_v23 }
 0x35c   : > { %v2455_v33 = vpop.eup %1628  ;;  %1648 = vpow2.f32 %v985_v20 }
 0x35d   : > { %v2457_v5 = vpop.eup %1630  ;;  %1650 = vpow2.f32 %v987_v24  ;;  %1064 = vadd.xlane.f32.xlu0 %v1063_v32  ;;  %v1066_v29 = vadd.f32 %v2455_v33, %v2451_v19 }
 0x35e   : > { %2694 = vst [vmem:[#allocation11_spill] sm:$0xff] %v2457_v5  ;;  %v2461_v52 = vpop.eup %1632  ;;  %1652 = vpow2.f32 %v989_v34 }
 0x35f   : > { %v2463_v15 = vpop.eup %1634  ;;  %1067 = vadd.xlane.f32.xlu1 %v1066_v29  ;;  %v1069_v9 = vadd.f32 %v2461_v52, %v2457_v5 }
 0x360   : > { %2695 = vst [vmem:[#allocation12_spill] sm:$0xff] %v2463_v15  ;;  %v2467_v21 = vpop.eup %1636 }
 0x361   : > { %2696 = vst [vmem:[#allocation13_spill] sm:$0xff] %v2467_v21  ;;  %v2469_v36 = vpop.eup %1638  ;;  %1070 = vadd.xlane.f32.xlu0 %v1069_v9  ;;  %v1072_v30 = vadd.f32 %v2467_v21, %v2463_v15 }
 0x362   : > { %2697 = vst [vmem:[#allocation14_spill] sm:$0xff] %v2469_v36  ;;  %v2473_v22 = vpop.eup %1640 }
 0x363   : > { %2698 = vst [vmem:[#allocation15_spill] sm:$0xff] %v2473_v22  ;;  %v2475_v58 = vpop.eup %1642  ;;  %1073 = vadd.xlane.f32.xlu1 %v1072_v30  ;;  %v1075_v41 = vadd.f32 %v2473_v22, %v2469_v36 }
 0x364   : > { %2699 = vst [vmem:[#allocation16_spill] sm:$0xff] %v2475_v58  ;;  %v2479_v42 = vpop.eup %1644 }
 0x365   : > { %2700 = vst [vmem:[#allocation17_spill] sm:$0xff] %v2479_v42  ;;  %v2481_v20 = vpop.eup %1646  ;;  %1076 = vadd.xlane.f32.xlu0 %v1075_v41  ;;  %v1078_v24 = vadd.f32 %v2479_v42, %v2475_v58 }
 0x366   : > { %2701 = vst [vmem:[#allocation18_spill] sm:$0xff] %v2481_v20  ;;  %v2485_v34 = vpop.eup %1648 }
 0x367   : > { %2702 = vst [vmem:[#allocation19_spill] sm:$0xff] %v2485_v34  ;;  %v2487_v32 = vpop.eup %1650  ;;  %1079 = vadd.xlane.f32.xlu1 %v1078_v24  ;;  %v1081_v29 = vadd.f32 %v2485_v34, %v2481_v20 }
 0x368   : > { %2703 = vst [vmem:[#allocation20_spill] sm:$0xff] %v2487_v32  ;;  %v2491_v9 = vpop.eup %1652 }
 0x369   : > { %1082 = vadd.xlane.f32.xlu0 %v1081_v29  ;;  %v1084_v30 = vadd.f32 %v2491_v9, %v2487_v32 }
 0x36b   : > { %1085 = vadd.xlane.f32.xlu1 %v1084_v30 }
 0x379   : > { %v2495_v36 = vpop.f32.mrb[20].mxu1 }
 0x37a   : > { %2704 = vst [vmem:[#allocation25_spill] sm:$0xff] %v2495_v36  ;;  %v1255_v41 = vpop.f32.mrb[21].mxu1 }
 0x37b   : > { %v1261_v22 = vpack.c.bf16 %v1255_v41, %v1255_v41  ;;  %v1257_v58 = vpop.f32.mrb[22].mxu1 }
 0x37c   : > { %v1258_v42 = vpop.f32.mrb[23].mxu1 }
 0x37d   : > { %1295 = vmatprep.mubr.bf16.mxu1 %v1261_v22 }
 0x38a   : > { %v993_v15 = vpop.xlane.xlu0 %992 }
 0x38b   : > { %1654 = vrcp.f32 %v993_v15 }
 0x38e   : > { %v996_v24 = vpop.xlane.xlu1 %995 }
 0x38f   : > { %1656 = vrcp.f32 %v996_v24 }
 0x392   : > { %v999_v5 = vpop.xlane.xlu0 %998 }
 0x393   : > { %1658 = vrcp.f32 %v999_v5 }
 0x395   : > { %v1655_v34 = vpop.eup %1654 }
 0x396   : > { %v1002_v20 = vpop.xlane.xlu1 %1001  ;;  %v1120_v30 = vmul.f32 %v1655_v34, %v2249_v6  ;;  %v1119_v41 = vmul.f32 %v1655_v34, %v2247_v47 }
 0x397   : > { %1660 = vrcp.f32 %v1002_v20 }
 0x399   : > { %v1657_v29 = vpop.eup %1656 }
 0x39a   : > { %v1005_v21 = vpop.xlane.xlu0 %1004  ;;  %v1122_v36 = vmul.f32 %v1657_v29, %v2257_v14  ;;  %v1121_v58 = vmul.f32 %v1657_v29, %v2255_v51 }
 0x39b   : > { %1662 = vrcp.f32 %v1005_v21 }
 0x39c   : > { %v1184_v22 = vpack.c.bf16 %v1122_v36, %v1120_v30  ;;  %v1183_v42 = vpack.c.bf16 %v1121_v58, %v1119_v41 }
 0x39d   : > { %v1659_v24 = vpop.eup %1658 }
 0x39e   : > { %1263 = vmatprep.subr.bf16.mxu1 %v1184_v22  ;;  %v1008_v15 = vpop.xlane.xlu1 %1007  ;;  %v1124_v32 = vmul.f32 %v1659_v24, %v2265_v43  ;;  %v1123_v14 = vmul.f32 %v1659_v24, %v2263_v56 }
 0x39f   : > { %1664 = vrcp.f32 %v1008_v15  ;;  %1264 = vmatpush1.bf16.msra.mxu1 %v1183_v42 }
 0x3a1   : > { %v1661_v5 = vpop.eup %1660 }
 0x3a2   : > { %v1011_v20 = vpop.xlane.xlu0 %1010  ;;  %v1126_v6 = vmul.f32 %v1661_v5, %v2273_v54  ;;  %v1125_v47 = vmul.f32 %v1661_v5, %v2271_v59 }
 0x3a3   : > { %1666 = vrcp.f32 %v1011_v20 }
 0x3a4   : > { %v1186_v34 = vpack.c.bf16 %v1126_v6, %v1124_v32  ;;  %v1185_v51 = vpack.c.bf16 %v1125_v47, %v1123_v14 }
 0x3a5   : > { %v1663_v36 = vpop.eup %1662 }
 0x3a6   : > { %1265 = vmatprep.subr.bf16.mxu1 %v1186_v34  ;;  %v1014_v21 = vpop.xlane.xlu1 %1013  ;;  %v1128_v41 = vmul.f32 %v1663_v36, %v2281_v25  ;;  %v1127_v54 = vmul.f32 %v1663_v36, %v2279_v62 }
 0x3a7   : > { %1668 = vrcp.f32 %v1014_v21  ;;  %1266 = vmatpush1.bf16.msra.mxu1 %v1185_v51 }
 0x3a9   : > { %v1665_v29 = vpop.eup %1664 }
 0x3aa   : > { %v1017_v30 = vpop.xlane.xlu0 %1016  ;;  %v1130_v43 = vmul.f32 %v1665_v29, %v2291_v35  ;;  %v1129_v56 = vmul.f32 %v1665_v29, %v2287_v55 }
 0x3ab   : > { %1670 = vrcp.f32 %v1017_v30 }
 0x3ac   : > { %v1020_v59 = vpop.xlane.xlu1 %1019  ;;  %v1188_v32 = vpack.c.bf16 %v1130_v43, %v1128_v41  ;;  %v1187_v58 = vpack.c.bf16 %v1129_v56, %v1127_v54 }
 0x3ad   : > { %1672 = vrcp.f32 %v1020_v59  ;;  %v1667_v22 = vpop.eup %1666 }
 0x3ae   : > { %1267 = vmatprep.subr.bf16.mxu1 %v1188_v32  ;;  %v1132_v24 = vmul.f32 %v1667_v22, %v2297_v37  ;;  %v1131_v35 = vmul.f32 %v1667_v22, %v2295_v45 }
 0x3af   : > { %1268 = vmatpush1.bf16.msra.mxu1 %v1187_v58 }
 0x3b1   : > { %v1669_v42 = vpop.eup %1668 }
 0x3b2   : > { %v1023_v15 = vpop.xlane.xlu0 %1022  ;;  %v1134_v25 = vmul.f32 %v1669_v42, %v2305_v53  ;;  %v1133_v62 = vmul.f32 %v1669_v42, %v2303_v50 }
 0x3b3   : > { %1674 = vrcp.f32 %v1023_v15 }
 0x3b4   : > { %v1190_v5 = vpack.c.bf16 %v1134_v25, %v1132_v24  ;;  %v1189_v55 = vpack.c.bf16 %v1133_v62, %v1131_v35 }
 0x3b5   : > { %v1671_v20 = vpop.eup %1670 }
 0x3b6   : > { %1269 = vmatprep.subr.bf16.mxu1 %v1190_v5  ;;  %v1026_v6 = vpop.xlane.xlu1 %1025  ;;  %v1136_v47 = vmul.f32 %v1671_v20, %v2313_v39  ;;  %v1135_v37 = vmul.f32 %v1671_v20, %v2311_v10 }
 0x3b7   : > { %v1673_v14 = vpop.eup %1672  ;;  %1676 = vrcp.f32 %v1026_v6  ;;  %1270 = vmatpush1.bf16.msra.mxu1 %v1189_v55 }
 0x3b8   : > { %v1138_v34 = vmul.f32 %v1673_v14, %v2321_v3  ;;  %v1137_v53 = vmul.f32 %v1673_v14, %v2315_v44 }
 0x3ba   : > { %v1029_v45 = vpop.xlane.xlu0 %1028  ;;  %v1192_v51 = vpack.c.bf16 %v1138_v34, %v1136_v47  ;;  %v1191_v50 = vpack.c.bf16 %v1137_v53, %v1135_v37 }
 0x3bb   : > { %1678 = vrcp.f32 %v1029_v45 }
 0x3bc   : > { %1271 = vmatprep.subr.bf16.mxu1 %v1192_v51 }
 0x3bd   : > { %1272 = vmatpush1.bf16.msra.mxu1 %v1191_v50  ;;  %v1675_v36 = vpop.eup %1674 }
 0x3be   : > { %v1032_v21 = vpop.xlane.xlu1 %1031  ;;  %v1140_v41 = vmul.f32 %v1675_v36, %v2329_v0  ;;  %v1139_v3 = vmul.f32 %v1675_v36, %v2327_v16 }
 0x3bf   : > { %1680 = vrcp.f32 %v1032_v21 }
 0x3c1   : > { %v1677_v29 = vpop.eup %1676 }
 0x3c2   : > { %v1035_v30 = vpop.xlane.xlu0 %1034  ;;  %v1142_v39 = vmul.f32 %v1677_v29, %v2337_v1  ;;  %v1141_v10 = vmul.f32 %v1677_v29, %v2335_v17 }
 0x3c3   : > { %1682 = vrcp.f32 %v1035_v30 }
 0x3c4   : > { %v1194_v44 = vpack.c.bf16 %v1142_v39, %v1140_v41  ;;  %v1193_v43 = vpack.c.bf16 %v1141_v10, %v1139_v3  ;;  %v2705_v41 = vld [vmem:[#allocation21_spill] sm:$0xff]  ;;  %v2706_v39 = vld [vmem:[#allocation22_spill] sm:$0xff] }
 0x3c5   : > { %v1679_v56 = vpop.eup %1678 }
 0x3c6   : > { %1273 = vmatprep.subr.bf16.mxu1 %v1194_v44  ;;  %v1038_v54 = vpop.xlane.xlu1 %1037  ;;  %v1144_v58 = vmul.f32 %v1679_v56, %v2345_v4  ;;  %v1143_v1 = vmul.f32 %v1679_v56, %v2343_v28 }
 0x3c7   : > { %1684 = vrcp.f32 %v1038_v54  ;;  %1274 = vmatpush1.bf16.msra.mxu1 %v1193_v43 }
 0x3c9   : > { %v1681_v59 = vpop.eup %1680 }
 0x3ca   : > { %v1041_v32 = vpop.xlane.xlu0 %1040  ;;  %v1146_v0 = vmul.f32 %v1681_v59, %v2353_v61  ;;  %v1145_v16 = vmul.f32 %v1681_v59, %v2351_v31 }
 0x3cb   : > { %1686 = vrcp.f32 %v1041_v32 }
 0x3cc   : > { %v1196_v22 = vpack.c.bf16 %v1146_v0, %v1144_v58  ;;  %v1195_v17 = vpack.c.bf16 %v1145_v16, %v1143_v1  ;;  %v2708_v58 = vld [vmem:[#allocation23_spill] sm:$0xff] }
 0x3cd   : > { %v1683_v15 = vpop.eup %1682 }
 0x3ce   : > { %1275 = vmatprep.subr.bf16.mxu1 %v1196_v22  ;;  %v1044_v42 = vpop.xlane.xlu1 %1043  ;;  %v1148_v35 = vmul.f32 %v1683_v15, %v2361_v63  ;;  %v1147_v61 = vmul.f32 %v1683_v15, %v2359_v40 }
 0x3cf   : > { %1688 = vrcp.f32 %v1044_v42  ;;  %1276 = vmatpush1.bf16.msra.mxu1 %v1195_v17 }
 0x3d1   : > { %v1685_v24 = vpop.eup %1684 }
 0x3d2   : > { %v1047_v25 = vpop.xlane.xlu0 %1046  ;;  %v1150_v4 = vmul.f32 %v1685_v24, %v2369_v57  ;;  %v1149_v28 = vmul.f32 %v1685_v24, %v2367_v46 }
 0x3d3   : > { %1690 = vrcp.f32 %v1047_v25 }
 0x3d4   : > { %v1198_v62 = vpack.c.bf16 %v1150_v4, %v1148_v35  ;;  %v1197_v31 = vpack.c.bf16 %v1149_v28, %v1147_v61 }
 0x3d5   : > { %v1687_v55 = vpop.eup %1686 }
 0x3d6   : > { %1277 = vmatprep.subr.bf16.mxu1 %v1198_v62  ;;  %v1050_v5 = vpop.xlane.xlu1 %1049  ;;  %v1152_v14 = vmul.f32 %v1687_v55, %v2377_v49  ;;  %v1151_v57 = vmul.f32 %v1687_v55, %v2375_v8 }
 0x3d7   : > { %1692 = vrcp.f32 %v1050_v5  ;;  %1278 = vmatpush1.bf16.msra.mxu1 %v1197_v31 }
 0x3d9   : > { %v1689_v20 = vpop.eup %1688 }
 0x3da   : > { %v1053_v6 = vpop.xlane.xlu0 %1052  ;;  %v1154_v63 = vmul.f32 %v1689_v20, %v2387_v11  ;;  %v1153_v40 = vmul.f32 %v1689_v20, %v2383_v38  ;;  %v2709_v20 = vld [vmem:[#allocation13_spill] sm:$0xff] }
 0x3db   : > { %1694 = vrcp.f32 %v1053_v6 }
 0x3dc   : > { %v1200_v46 = vpack.c.bf16 %v1154_v63, %v1152_v14  ;;  %v1199_v47 = vpack.c.bf16 %v1153_v40, %v1151_v57  ;;  %v2710_v14 = vld [vmem:[#allocation11_spill] sm:$0xff]  ;;  %v2711_v57 = vld [vmem:[#allocation12_spill] sm:$0xff] }
 0x3dd   : > { %v1056_v34 = vpop.xlane.xlu1 %1055  ;;  %v1691_v37 = vpop.eup %1690 }
 0x3de   : > { %1696 = vrcp.f32 %v1056_v34  ;;  %1279 = vmatprep.subr.bf16.mxu1 %v1200_v46  ;;  %v1156_v45 = vmul.f32 %v1691_v37, %v2393_v13  ;;  %v1155_v49 = vmul.f32 %v1691_v37, %v2391_v26  ;;  %v2713_v34 = vld [vmem:[#allocation17_spill] sm:$0xff] }
 0x3df   : > { %1280 = vmatpush1.bf16.msra.mxu1 %v1199_v47 }
 0x3e1   : > { %v1693_v53 = vpop.eup %1692 }
 0x3e2   : > { %v1158_v51 = vmul.f32 %v1693_v53, %v2403_v18  ;;  %v1157_v11 = vmul.f32 %v1693_v53, %v2399_v2  ;;  %v2714_v53 = vld [vmem:[#allocation14_spill] sm:$0xff] }
 0x3e3   : > { %v1059_v8 = vpop.xlane.xlu0 %1058 }
 0x3e4   : > { %1698 = vrcp.f32 %v1059_v8  ;;  %v1202_v38 = vpack.c.bf16 %v1158_v51, %v1156_v45  ;;  %v1201_v50 = vpack.c.bf16 %v1157_v11, %v1155_v49  ;;  %v2715_v51 = vld [vmem:[#allocation16_spill] sm:$0xff] }
 0x3e5   : > { %v1062_v21 = vpop.xlane.xlu1 %1061  ;;  %v1695_v36 = vpop.eup %1694 }
 0x3e6   : > { %1700 = vrcp.f32 %v1062_v21  ;;  %1281 = vmatprep.subr.bf16.mxu1 %v1202_v38  ;;  %v1160_v30 = vmul.f32 %v1695_v36, %v2409_v60  ;;  %v1159_v18 = vmul.f32 %v1695_v36, %v2705_v41  ;;  %v2707_v60 = vld [vmem:[#allocation24_spill] sm:$0xff] }
 0x3e7   : > { %1282 = vmatpush1.bf16.msra.mxu1 %v1201_v50  ;;  %v2716_v50 = vld [vmem:[#allocation19_spill] sm:$0xff] }
 0x3e8   : > { %v1697_v29 = vpop.eup %1696 }
 0x3e9   : > { %v1162_v13 = vmul.f32 %v1697_v29, %v2417_v7  ;;  %v1161_v26 = vmul.f32 %v1697_v29, %v2706_v39  ;;  %v2717_v29 = vld [vmem:[#allocation18_spill] sm:$0xff] }
 0x3ea   : > { %v1065_v3 = vpop.xlane.xlu0 %1064 }
 0x3eb   : > { %1702 = vrcp.f32 %v1065_v3  ;;  %v1204_v2 = vpack.c.bf16 %v1162_v13, %v1160_v30  ;;  %v1203_v10 = vpack.c.bf16 %v1161_v26, %v1159_v18  ;;  %v2718_v13 = vld [vmem:[#allocation20_spill] sm:$0xff]  ;;  %v2719_v26 = vld [vmem:[#allocation25_spill] sm:$0xff] }
 0x3ec   : > { %v1068_v44 = vpop.xlane.xlu1 %1067  ;;  %v1260_v3 = vpack.c.bf16 %v2719_v26, %v2719_v26 }
 0x3ed   : > { %1283 = vmatprep.subr.bf16.mxu1 %v1204_v2  ;;  %1704 = vrcp.f32 %v1068_v44 }
 0x3ee   : > { %v1699_v43 = vpop.eup %1698  ;;  %1284 = vmatpush1.bf16.msra.mxu1 %v1203_v10  ;;  %v1071_v54 = vpop.xlane.xlu0 %1070  ;;  %v1316_v10 = vstv %s1315_s10 }
 0x3ef   : > { %1706 = vrcp.f32 %v1071_v54  ;;  %v1164_v32 = vmul.f32 %v1699_v43, %v2707_v60  ;;  %v1163_v0 = vmul.f32 %v1699_v43, %v2708_v58  ;;  %v1314_v54 = vld [vmem:[%s1985_s18] sm:$0xff]  ;;  %s1748_s18 = scalar_lea.vmem %s2572_s14, 128 }
 0x3f0   : > { %v1701_v56 = vpop.eup %1700  ;;  %v1074_v59 = vpop.xlane.xlu1 %1073  ;;  %p1749_p8 = scmp.ne.s32.totalorder %s2572_s14, %s1748_s18  ;;  %p1756_p13 = scmp.lt.s32.totalorder %s1754_s19, %s1748_s18 }
 0x3f1   : > { %1708 = vrcp.f32 %v1074_v59  ;;  %v1166_v7 = vmul.f32 %v1701_v56, %v2434_v12  ;;  %v1165_v1 = vmul.f32 %v1701_v56, %v2431_v27 }
 0x3f2   : > { %v1077_v16 = vpop.xlane.xlu0 %1076  ;;  %p1750_p11 = pnand %p1749_p8, %p2720_p9  ;;  %p1757_p3 = por %p1756_p13, %p1755_p7 }
 0x3f3   : > { %1710 = vrcp.f32 %v1077_v16  ;;  %v1206_v22 = vpack.c.bf16 %v1166_v7, %v1164_v32  ;;  %v1205_v17 = vpack.c.bf16 %v1165_v1, %v1163_v0 }
 0x3f4   : > { %v1080_v42 = vpop.xlane.xlu1 %1079  ;;  %p1751_p0 = pneg %p1750_p11 }
 0x3f5   : > { %v1703_v15 = vpop.eup %1702  ;;  %1285 = vmatprep.subr.bf16.mxu1 %v1206_v22  ;;  %1712 = vrcp.f32 %v1080_v42 }
 0x3f6   : > { %1286 = vmatpush1.bf16.msra.mxu1 %v1205_v17  ;;  %v1083_v24 = vpop.xlane.xlu0 %1082  ;;  %v1168_v4 = vmul.f32 %v1703_v15, %v2449_v48  ;;  %v1167_v61 = vmul.f32 %v1703_v15, %v2445_v23  ;;  %p1758_p6 = pnand %p1757_p3, %p1751_p0 }
 0x3f7   : > { %v1705_v25 = vpop.eup %1704  ;;  %1714 = vrcp.f32 %v1083_v24 }
 0x3f8   : > { %v1086_v35 = vpop.xlane.xlu1 %1085  ;;  %v1170_v12 = vmul.f32 %v1705_v25, %v2455_v33  ;;  %v1169_v27 = vmul.f32 %v1705_v25, %v2451_v19  ;;  %v2712_v19 = vld [vmem:[#allocation15_spill] sm:$0xff] }
 0x3f9   : > { %v1707_v28 = vpop.eup %1706  ;;  %1716 = vrcp.f32 %v1086_v35 }
 0x3fa   : > { %v1208_v62 = vpack.c.bf16 %v1170_v12, %v1168_v4  ;;  %v1207_v31 = vpack.c.bf16 %v1169_v27, %v1167_v61  ;;  %v1172_v55 = vmul.f32 %v1707_v28, %v2461_v52  ;;  %v1171_v63 = vmul.f32 %v1707_v28, %v2710_v14 }
 0x3fb   : > { %v1709_v5 = vpop.eup %1708 }
 0x3fc   : > { %1287 = vmatprep.subr.bf16.mxu1 %v1208_v62  ;;  %v1174_v6 = vmul.f32 %v1709_v5, %v2709_v20  ;;  %v1173_v48 = vmul.f32 %v1709_v5, %v2711_v57 }
 0x3fd   : > { %v1711_v40 = vpop.eup %1710  ;;  %1288 = vmatpush1.bf16.msra.mxu1 %v1207_v31 }
 0x3fe   : > { %v1210_v33 = vpack.c.bf16 %v1174_v6, %v1172_v55  ;;  %v1209_v23 = vpack.c.bf16 %v1173_v48, %v1171_v63  ;;  %v1176_v47 = vmul.f32 %v1711_v40, %v2712_v19  ;;  %v1175_v45 = vmul.f32 %v1711_v40, %v2714_v53 }
 0x3ff   : > { %v1713_v46 = vpop.eup %1712 }
 0x400   : > { %1289 = vmatprep.subr.bf16.mxu1 %v1210_v33  ;;  %v1178_v37 = vmul.f32 %v1713_v46, %v2713_v34  ;;  %v1177_v52 = vmul.f32 %v1713_v46, %v2715_v51 }
 0x401   : > { %v1715_v49 = vpop.eup %1714  ;;  %1290 = vmatpush1.bf16.msra.mxu1 %v1209_v23 }
 0x402   : > { %v1212_v11 = vpack.c.bf16 %v1178_v37, %v1176_v47  ;;  %v1211_v8 = vpack.c.bf16 %v1177_v52, %v1175_v45  ;;  %v1180_v21 = vmul.f32 %v1715_v49, %v2716_v50  ;;  %v1179_v30 = vmul.f32 %v1715_v49, %v2717_v29 }
 0x403   : > { %v1717_v38 = vpop.eup %1716 }
 0x404   : > { %1291 = vmatprep.subr.bf16.mxu1 %v1212_v11  ;;  %v1182_v36 = vmul.f32 %v1717_v38, %v2491_v9  ;;  %v1181_v41 = vmul.f32 %v1717_v38, %v2718_v13 }
 0x405   : > { %1292 = vmatpush1.bf16.msra.mxu1 %v1211_v8 }
 0x406   : > { %v1214_v18 = vpack.c.bf16 %v1182_v36, %v1180_v21  ;;  %v1213_v39 = vpack.c.bf16 %v1181_v41, %v1179_v30 }
 0x408   : > { %1293 = vmatprep.subr.bf16.mxu1 %v1214_v18 }
 0x409   : > { %1294 = vmatpush1.bf16.msra.mxu1 %v1213_v39 }
 0x40c   : > { %1296 = vmatmul.mubr.bf16.vlgmr.msra.gmra.mrb[24].mxu1 %v1260_v3 }
 0x4df   : > { %v1297_v2 = vpop.f32.mrb[24].mxu1 }
 0x4e0   : > { %v1299_v9 = vpop.f32.mrb[25].mxu1 }
 0x4e1   : > { %v1306_v44 = vcombine.low %v1297_v2, %v1299_v9  ;;  %v1301_v43 = vpop.f32.mrb[26].mxu1 }
 0x4e2   : > { %v1302_v56 = vpop.f32.mrb[27].mxu1 }
 0x4e3   : > { %v1317_v59 = vmul.f32 %v1316_v10, %v1306_v44 }
 0x4e5   : > { %v1318_v60 = vadd.f32 %v1317_v59, %v1314_v54 }
 0x4e7   : > { %1319 = vst [vmem:[%s253_s13] sm:$0xff] %v1318_v60 }
 0x4e8   : > { %1761 = shalt.err (!%p1758_p6)
}
 0x4e9   : > { %s1762_s16 = scalar_lea.hbm %s2570_s17, 128  ;;  %s1766_s30 = scalar_lea.hbm %s2624_s5, 256 }
 0x4ea   : > { %p1763_p4 = scmp.ne.s32.totalorder %s2570_s17, %s1762_s16  ;;  %p1767_p1 = scmp.lt.u32.totalorder %s2570_s17, %s2624_s5 }
 0x4eb   : > { %p1768_p2 = scmp.lt.u32.totalorder %s1766_s30, %s1762_s16  ;;  %p1770_p8 = scmp.lt.u32.totalorder %s1762_s16, %s2570_s17 }
 0x4ec   : > { %p1764_p10 = pnand %p1763_p4, %p2720_p9 }
 0x4ed   : > { %p1769_p5 = por %p1768_p2, %p1767_p1 }
 0x4ee   : > { %p1765_p12 = pneg %p1764_p10 }
 0x4ef   : > { %p1771_p11 = por %p1770_p8, %p1769_p5 }
 0x4f1   : > { %p1772_p0 = pnand %p1771_p11, %p1765_p12 }
 0x4f3   : > { %1775 = shalt.err (!%p1772_p0)
}
 0x4f4   : > { %1461 = dma.vmem_to_hbm [thread:$0]  (%p2720_p9), %s2572_s14, 128, %s2570_s17, %s1321_s6  }
 0x4f5 PF: > { %s1347_s12 = sand.u32 1, %s1810_s20   ;;  %p2721_p7 = scmp.ne.s32.totalorder %s2657_s9, 0 }
 0x4f6   : > { %p2722_p13 = scmp.ge.s32.totalorder %s1830_s25, 2  ;;  %s1348_s13 = scalar_lea.sflag [#allocation7], %s1347_s12 }
 0x4f8   : > { %p1468_p3 = pnand %p2722_p13, %p2721_p7 }
 0x4fa   : > { %1805 = dma.done.wait (!%p1468_p3), %s1348_s13, 128  }
 0x4fb   : > { %1807 = vsyncadd (!%p1468_p3), %s1348_s13, 4294967168  ;;  %s22_s25 = sadd.s32 1, %s1830_s25   ;;  %s2723_s20 = smov %s1814_s21 }
 0x4fc   : > { %p19_p6 = scmp.ge.s32.totalorder %s22_s25, 4   ;;  %s2724_s21 = smov %s1818_s22 }
 0x4fd   : > { %s2725_s22 = smov %s1924_s8  ;;  %s2726_s23 = smov %s1826_s24 }
 0x4fe   : > { %s2727_s24 = smov %s2729_s27  ;;  %21 = sbr.rel (!%p19_p6) target bundleno = 8 (0x8), region = 94 }
 0x505   :  { %1353 = vsyncpa [#allocation6], 1 }
 0x506   :  { %1355 = vsyncpa [#allocation6 + $0x1], 1 }
 0x507   :  { %1356 = vsyncpa [#allocation7], 1 }
 0x508   :  { %1358 = vsyncpa [#allocation7 + $0x1], 1 }

</bundles_post_ra>
